<compile_context>
chip_gen: v5e
topology: v5e:2x2
jax: 0.10.0
libtpu: 0.0.40
codegen_flags: <defaults>
</compile_context>

<pallas_src>
import functools
import math

import jax
import jax.numpy as jnp
import numpy as np
from jax.experimental import pallas as pl
from jax.experimental.pallas import tpu as pltpu


def _round_up(v, m):
    return ((v + m - 1) // m) * m


# -----------------------------------------------------------------------------
# Kernel: whole forward pass in one invocation (no grid).
# -----------------------------------------------------------------------------
def _lstm_gaussian_kernel(num_layers, hidden_dim, output_dim, seq_len, b_pad,
                          x_ref, w0x_ref, w0h_ref, b0_ref, *refs):
    """refs = [w_fused_l, b_l for l in 1..L-1], w_out, b_out, out_ref."""
    H = hidden_dim
    G = 4 * H
    n_fused = num_layers - 1
    fused_refs = refs[: 2 * n_fused]
    w_out_ref, b_out_ref, out_ref = refs[2 * n_fused:]
    f32 = jnp.float32

    # Hoisted constants (JAX does not CSE broadcast_in_dim -> build once).
    lane = jax.lax.broadcasted_iota(jnp.int32, (b_pad, G), 1)
    g_block = (lane >= 2 * H) & (lane < 3 * H)   # the tanh ('g') gate lanes

    def activate(gates):
        # Full-width EUP activations + one VPU select; no sub-lane extraction.
        return jnp.where(g_block, jnp.tanh(gates), jax.nn.sigmoid(gates))

    def cell(gates, c_prev):
        """One LSTM cell step on 4H-wide vregs.

        gate lane blocks: [i | f | g | o].  c is carried in block 1 (the 'f'
        position), h in block 3 (the 'o' position); the remaining blocks hold
        bounded garbage that only ever multiplies zero-padded weight rows.
        """
        a = activate(gates)
        # roll by 2H (direction-agnostic): i*g lands in blocks 0 and 2 ...
        ig = a * pltpu.roll(a, 2 * H, 1)
        # ... so a further roll by H puts i*g in blocks 1 and 3 either way.
        ig = pltpu.roll(ig, H, 1)
        c_new = a * c_prev + ig                   # block 1: f*c + i*g
        tc = jnp.tanh(c_new)
        h_new = a * pltpu.roll(tc, 2 * H, 1)      # block 3: o*tanh(c_new)
        return h_new, c_new

    # Layer-0 input projection for ALL timesteps in one MXU pass (bias folded).
    gx = (jnp.dot(x_ref[...], w0x_ref[...], preferred_element_type=f32)
          + b0_ref[...])                          # (T*Bp, 4H)

    h = [jnp.zeros((b_pad, G), f32) for _ in range(num_layers)]
    c = [jnp.zeros((b_pad, G), f32) for _ in range(num_layers)]

    # seq_len is small and static -> fully unrolled loop, state in registers.
    for t in range(seq_len):
        gates0 = gx[t * b_pad:(t + 1) * b_pad, :] + jnp.dot(
            h[0], w0h_ref[...], preferred_element_type=f32)
        h[0], c[0] = cell(gates0, c[0])
        for layer in range(1, num_layers):
            wf_ref = fused_refs[2 * (layer - 1)]
            bf_ref = fused_refs[2 * (layer - 1) + 1]
            stacked = jnp.concatenate([h[layer - 1], h[layer]], axis=1)  # (Bp, 8H)
            gates = jnp.dot(stacked, wf_ref[...],
                            preferred_element_type=f32) + bf_ref[...]
            h[layer], c[layer] = cell(gates, c[layer])

    # hidden2out on the last timestep's top-layer h, then exp on the variance
    # half (lanes [output_dim, 2*output_dim)).  Padded lanes are sliced off by
    # the wrapper.
    out = jnp.dot(h[num_layers - 1], w_out_ref[...],
                  preferred_element_type=f32) + b_out_ref[...]
    lane_o = jax.lax.broadcasted_iota(jnp.int32, out.shape, 1)
    var = (lane_o >= output_dim) & (lane_o < 2 * output_dim)
    out_ref[...] = jnp.where(var, jnp.exp(out), out)


# -----------------------------------------------------------------------------
# One-time weight packing (outside the per-call hot path).
# -----------------------------------------------------------------------------
def pack_params(params, *, input_dim, hidden_dim, num_layers, output_dim):
    """Transpose / fuse / zero-pad PyTorch-layout LSTM+Linear weights.

    Inside the kernel h lives in lane block 3 and c in lane block 1, so the
    recurrent / output weight rows are placed at row offset 3H and every other
    row is zero (garbage lanes then contribute exactly 0).
    """
    H = hidden_dim
    G = 4 * H
    d_pad = _round_up(max(input_dim, 1), 128)
    o_pad = _round_up(max(2 * output_dim, 1), 128)

    w_ih0, w_hh0, b_ih0, b_hh0 = params["lstm"][0]
    w0x = jnp.zeros((d_pad, G), jnp.float32).at[:input_dim, :].set(
        jnp.asarray(w_ih0, jnp.float32).T)
    w0h = jnp.zeros((G, G), jnp.float32).at[3 * H:4 * H, :].set(
        jnp.asarray(w_hh0, jnp.float32).T)
    b0 = (jnp.asarray(b_ih0, jnp.float32)
          + jnp.asarray(b_hh0, jnp.float32)).reshape(1, G)

    fused = []
    for layer in range(1, num_layers):
        w_ih, w_hh, b_ih, b_hh = params["lstm"][layer]
        w = jnp.zeros((2 * G, G), jnp.float32)
        w = w.at[3 * H:4 * H, :].set(jnp.asarray(w_ih, jnp.float32).T)
        w = w.at[G + 3 * H:2 * G, :].set(jnp.asarray(w_hh, jnp.float32).T)
        b = (jnp.asarray(b_ih, jnp.float32)
             + jnp.asarray(b_hh, jnp.float32)).reshape(1, G)
        fused.append((w, b))

    w_out, b_out = params["linear"]
    wo = jnp.zeros((G, o_pad), jnp.float32).at[
        3 * H:4 * H, :2 * output_dim].set(jnp.asarray(w_out, jnp.float32).T)
    bo = jnp.zeros((1, o_pad), jnp.float32).at[0, :2 * output_dim].set(
        jnp.asarray(b_out, jnp.float32))

    return {"w0x": w0x, "w0h": w0h, "b0": b0, "fused": fused,
            "w_out": wo, "b_out": bo, "d_pad": d_pad, "o_pad": o_pad}


# -----------------------------------------------------------------------------
# Wrapper
# -----------------------------------------------------------------------------
def screwing_model_gaussian(x, packed, *, hidden_dim, num_layers, output_dim):
    """full_seq=False forward pass: returns (B, 2*output_dim) float32."""
    # TODO(synk): full_seq=True (per-timestep outputs) is not implemented; the
    # module's default full_seq=False path is what this kernel computes.
    x = x.astype(jnp.float32)
    B, T, Din = x.shape
    d_pad = packed["d_pad"]
    o_pad = packed["o_pad"]
    Bp = _round_up(max(B, 8), 8)          # f32 sublane minimum

    # Layout plumbing only: time-major, batch + feature zero-padding.
    x_tm = jnp.transpose(x, (1, 0, 2))                       # (T, B, Din)
    x_p = jnp.zeros((T, Bp, d_pad), jnp.float32).at[:, :B, :Din].set(x_tm)
    x_p = x_p.reshape(T * Bp, d_pad)

    inputs = [x_p, packed["w0x"], packed["w0h"], packed["b0"]]
    for w, b in packed["fused"]:
        inputs += [w, b]
    inputs += [packed["w_out"], packed["b_out"]]

    kernel = functools.partial(
        _lstm_gaussian_kernel, num_layers, hidden_dim, output_dim, T, Bp)

    out = pl.pallas_call(
        kernel,
        out_shape=jax.ShapeDtypeStruct((Bp, o_pad), jnp.float32),
        in_specs=[pl.BlockSpec(memory_space=pltpu.MemorySpace.VMEM)
                  for _ in inputs],
        out_specs=pl.BlockSpec(memory_space=pltpu.MemorySpace.VMEM),
    )(*inputs)
    return out[:B, :2 * output_dim]


# -----------------------------------------------------------------------------
# Deterministic parameter init (PyTorch nn.LSTM / nn.Linear shapes & init).
# -----------------------------------------------------------------------------
def init_params(key, input_dim, hidden_dim, num_layers, output_dim):
    k = 1.0 / math.sqrt(hidden_dim)
    params = {"lstm": [], "linear": None}
    for layer in range(num_layers):
        in_l = input_dim if layer == 0 else hidden_dim
        key, k1, k2, k3, k4 = jax.random.split(key, 5)
        w_ih = jax.random.uniform(k1, (4 * hidden_dim, in_l), jnp.float32, -k, k)
        w_hh = jax.random.uniform(k2, (4 * hidden_dim, hidden_dim), jnp.float32, -k, k)
        b_ih = jax.random.uniform(k3, (4 * hidden_dim,), jnp.float32, -k, k)
        b_hh = jax.random.uniform(k4, (4 * hidden_dim,), jnp.float32, -k, k)
        params["lstm"].append((w_ih, w_hh, b_ih, b_hh))
    key, k1, k2 = jax.random.split(key, 3)
    w_out = jax.random.uniform(k1, (2 * output_dim, hidden_dim), jnp.float32, -k, k)
    b_out = jax.random.uniform(k2, (2 * output_dim,), jnp.float32, -k, k)
    params["linear"] = (w_out, b_out)
    return params


# -----------------------------------------------------------------------------
# Pure-JAX reference (mirrors the PyTorch forward, full_seq=False)
# -----------------------------------------------------------------------------
def reference(x, params, *, hidden_dim, num_layers, output_dim):
    x = x.astype(jnp.float32)
    B, T, _ = x.shape
    h = [jnp.zeros((B, hidden_dim), jnp.float32) for _ in range(num_layers)]
    c = [jnp.zeros((B, hidden_dim), jnp.float32) for _ in range(num_layers)]
    last = None
    for t in range(T):
        inp = x[:, t, :]
        for layer in range(num_layers):
            w_ih, w_hh, b_ih, b_hh = params["lstm"][layer]
            gates = inp @ w_ih.T + b_ih + h[layer] @ w_hh.T + b_hh
            i = jax.nn.sigmoid(gates[:, :hidden_dim])
            f = jax.nn.sigmoid(gates[:, hidden_dim:2 * hidden_dim])
            g = jnp.tanh(gates[:, 2 * hidden_dim:3 * hidden_dim])
            o = jax.nn.sigmoid(gates[:, 3 * hidden_dim:])
            c[layer] = f * c[layer] + i * g
            h[layer] = o * jnp.tanh(c[layer])
            inp = h[layer]
        last = inp
    w_out, b_out = params["linear"]
    out = last @ w_out.T + b_out
    return jnp.concatenate(
        [out[:, :output_dim], jnp.exp(out[:, output_dim:])], axis=-1
    )


# -----------------------------------------------------------------------------
if __name__ == "__main__":
    B, T = 2, 8
    INPUT_DIM, HIDDEN_DIM, NUM_LAYERS, OUTPUT_DIM = 8, 32, 2, 4

    root = jax.random.PRNGKey(0)
    k_params, k_x = jax.random.split(root)
    params = init_params(k_params, INPUT_DIM, HIDDEN_DIM, NUM_LAYERS, OUTPUT_DIM)
    x = jax.random.normal(k_x, (B, T, INPUT_DIM), jnp.float32)

    packed = pack_params(params, input_dim=INPUT_DIM, hidden_dim=HIDDEN_DIM,
                         num_layers=NUM_LAYERS, output_dim=OUTPUT_DIM)

    out = screwing_model_gaussian(
        x, packed,
        hidden_dim=HIDDEN_DIM, num_layers=NUM_LAYERS, output_dim=OUTPUT_DIM,
    )
    out = jax.block_until_ready(out)

    ref = reference(
        x, params,
        hidden_dim=HIDDEN_DIM, num_layers=NUM_LAYERS, output_dim=OUTPUT_DIM,
    )
    np.testing.assert_allclose(np.asarray(out), np.asarray(ref),
                               rtol=5e-5, atol=5e-5)

    print("KERNEL_OK")
</pallas_src>

<mosaic_0001>
module attributes {stable_mosaic.version = 11 : i64} {
  func.func @_lstm_gaussian_kernel(%arg0: memref<64x128xf32, #tpu.memory_space<vmem>>, %arg1: memref<128x128xf32, #tpu.memory_space<vmem>>, %arg2: memref<128x128xf32, #tpu.memory_space<vmem>>, %arg3: memref<1x128xf32, #tpu.memory_space<vmem>>, %arg4: memref<256x128xf32, #tpu.memory_space<vmem>>, %arg5: memref<1x128xf32, #tpu.memory_space<vmem>>, %arg6: memref<128x128xf32, #tpu.memory_space<vmem>>, %arg7: memref<1x128xf32, #tpu.memory_space<vmem>>, %arg8: memref<8x128xf32, #tpu.memory_space<vmem>>) attributes {dimension_semantics = [], scalar_prefetch = 0 : i64, scratch_operands = 0 : i64, tpu.core_type = #tpu.core_type<tc>} {
    %0 = tpu.iota {dimensions = array<i32: 1>} : vector<8x128xi32>
    %c64_i32 = arith.constant 64 : i32
    %1 = vector.broadcast %c64_i32 : i32 to vector<8x128xi32>
    %2 = arith.cmpi sge, %0, %1 : vector<8x128xi32>
    %c96_i32 = arith.constant 96 : i32
    %3 = vector.broadcast %c96_i32 : i32 to vector<8x128xi32>
    %4 = arith.cmpi slt, %0, %3 : vector<8x128xi32>
    %5 = arith.andi %2, %4 : vector<8x128xi1>
    %c0 = arith.constant 0 : index
    %c0_0 = arith.constant 0 : index
    %6 = vector.load %arg0[%c0, %c0_0] : memref<64x128xf32, #tpu.memory_space<vmem>>, vector<64x128xf32>
    %c0_1 = arith.constant 0 : index
    %c0_2 = arith.constant 0 : index
    %7 = vector.load %arg1[%c0_1, %c0_2] : memref<128x128xf32, #tpu.memory_space<vmem>>, vector<128x128xf32>
    %cst = arith.constant dense<0.000000e+00> : vector<64x128xf32>
    %8 = tpu.matmul %6, %7, %cst {dimension_numbers = #tpu.dot_dimension_numbers<[1], [0], [0], [1], [0, 0, 1, 1], [], []>} : vector<64x128xf32>, vector<128x128xf32>, vector<64x128xf32> -> vector<64x128xf32>
    %c0_3 = arith.constant 0 : index
    %c0_4 = arith.constant 0 : index
    %9 = vector.load %arg3[%c0_3, %c0_4] : memref<1x128xf32, #tpu.memory_space<vmem>>, vector<1x128xf32>
    %10 = vector.broadcast %9 : vector<1x128xf32> to vector<64x128xf32>
    %11 = arith.addf %8, %10 : vector<64x128xf32>
    %cst_5 = arith.constant 0.000000e+00 : f32
    %12 = vector.broadcast %cst_5 : f32 to vector<8x128xf32>
    %cst_6 = arith.constant 0.000000e+00 : f32
    %13 = vector.broadcast %cst_6 : f32 to vector<8x128xf32>
    %cst_7 = arith.constant 0.000000e+00 : f32
    %14 = vector.broadcast %cst_7 : f32 to vector<8x128xf32>
    %cst_8 = arith.constant 0.000000e+00 : f32
    %15 = vector.broadcast %cst_8 : f32 to vector<8x128xf32>
    %16 = vector.extract_strided_slice %11 {offsets = [0, 0], sizes = [8, 128], strides = [1, 1]} : vector<64x128xf32> to vector<8x128xf32>
    %c0_9 = arith.constant 0 : index
    %c0_10 = arith.constant 0 : index
    %17 = vector.load %arg2[%c0_9, %c0_10] : memref<128x128xf32, #tpu.memory_space<vmem>>, vector<128x128xf32>
    %cst_11 = arith.constant dense<0.000000e+00> : vector<8x128xf32>
    %18 = tpu.matmul %12, %17, %cst_11 {dimension_numbers = #tpu.dot_dimension_numbers<[1], [0], [0], [1], [0, 0, 1, 1], [], []>} : vector<8x128xf32>, vector<128x128xf32>, vector<8x128xf32> -> vector<8x128xf32>
    %19 = arith.addf %16, %18 : vector<8x128xf32>
    %20 = math.tanh %19 : vector<8x128xf32>
    %21 = arith.negf %19 : vector<8x128xf32>
    %22 = math.exp %21 : vector<8x128xf32>
    %cst_12 = arith.constant 1.000000e+00 : f32
    %23 = vector.broadcast %cst_12 : f32 to vector<8x128xf32>
    %24 = arith.addf %23, %22 : vector<8x128xf32>
    %25 = arith.divf %23, %24 : vector<8x128xf32>
    %26 = arith.select %5, %20, %25 : vector<8x128xi1>, vector<8x128xf32>
    %c64_i32_13 = arith.constant 64 : i32
    %27 = tpu.dynamic_rotate %26 by %c64_i32_13 dim 1 : vector<8x128xf32>, i32 -> vector<8x128xf32>
    %28 = arith.mulf %26, %27 : vector<8x128xf32>
    %c32_i32 = arith.constant 32 : i32
    %29 = tpu.dynamic_rotate %28 by %c32_i32 dim 1 : vector<8x128xf32>, i32 -> vector<8x128xf32>
    %30 = arith.mulf %26, %14 : vector<8x128xf32>
    %31 = arith.addf %30, %29 : vector<8x128xf32>
    %32 = math.tanh %31 : vector<8x128xf32>
    %c64_i32_14 = arith.constant 64 : i32
    %33 = tpu.dynamic_rotate %32 by %c64_i32_14 dim 1 : vector<8x128xf32>, i32 -> vector<8x128xf32>
    %34 = arith.mulf %26, %33 : vector<8x128xf32>
    %35 = tpu.concatenate %34, %13 in 1 : vector<8x128xf32>, vector<8x128xf32> -> vector<8x256xf32>
    %c0_15 = arith.constant 0 : index
    %c0_16 = arith.constant 0 : index
    %36 = vector.load %arg4[%c0_15, %c0_16] : memref<256x128xf32, #tpu.memory_space<vmem>>, vector<256x128xf32>
    %cst_17 = arith.constant dense<0.000000e+00> : vector<8x128xf32>
    %37 = tpu.matmul %35, %36, %cst_17 {dimension_numbers = #tpu.dot_dimension_numbers<[1], [0], [0], [1], [0, 0, 1, 1], [], []>} : vector<8x256xf32>, vector<256x128xf32>, vector<8x128xf32> -> vector<8x128xf32>
    %c0_18 = arith.constant 0 : index
    %c0_19 = arith.constant 0 : index
    %38 = vector.load %arg5[%c0_18, %c0_19] : memref<1x128xf32, #tpu.memory_space<vmem>>, vector<1x128xf32>
    %39 = vector.broadcast %38 : vector<1x128xf32> to vector<8x128xf32>
    %40 = arith.addf %37, %39 : vector<8x128xf32>
    %41 = math.tanh %40 : vector<8x128xf32>
    %42 = arith.negf %40 : vector<8x128xf32>
    %43 = math.exp %42 : vector<8x128xf32>
    %cst_20 = arith.constant 1.000000e+00 : f32
    %44 = vector.broadcast %cst_20 : f32 to vector<8x128xf32>
    %45 = arith.addf %44, %43 : vector<8x128xf32>
    %46 = arith.divf %44, %45 : vector<8x128xf32>
    %47 = arith.select %5, %41, %46 : vector<8x128xi1>, vector<8x128xf32>
    %c64_i32_21 = arith.constant 64 : i32
    %48 = tpu.dynamic_rotate %47 by %c64_i32_21 dim 1 : vector<8x128xf32>, i32 -> vector<8x128xf32>
    %49 = arith.mulf %47, %48 : vector<8x128xf32>
    %c32_i32_22 = arith.constant 32 : i32
    %50 = tpu.dynamic_rotate %49 by %c32_i32_22 dim 1 : vector<8x128xf32>, i32 -> vector<8x128xf32>
    %51 = arith.mulf %47, %15 : vector<8x128xf32>
    %52 = arith.addf %51, %50 : vector<8x128xf32>
    %53 = math.tanh %52 : vector<8x128xf32>
    %c64_i32_23 = arith.constant 64 : i32
    %54 = tpu.dynamic_rotate %53 by %c64_i32_23 dim 1 : vector<8x128xf32>, i32 -> vector<8x128xf32>
    %55 = arith.mulf %47, %54 : vector<8x128xf32>
    %56 = vector.extract_strided_slice %11 {offsets = [8, 0], sizes = [8, 128], strides = [1, 1]} : vector<64x128xf32> to vector<8x128xf32>
    %c0_24 = arith.constant 0 : index
    %c0_25 = arith.constant 0 : index
    %57 = vector.load %arg2[%c0_24, %c0_25] : memref<128x128xf32, #tpu.memory_space<vmem>>, vector<128x128xf32>
    %cst_26 = arith.constant dense<0.000000e+00> : vector<8x128xf32>
    %58 = tpu.matmul %34, %57, %cst_26 {dimension_numbers = #tpu.dot_dimension_numbers<[1], [0], [0], [1], [0, 0, 1, 1], [], []>} : vector<8x128xf32>, vector<128x128xf32>, vector<8x128xf32> -> vector<8x128xf32>
    %59 = arith.addf %56, %58 : vector<8x128xf32>
    %60 = math.tanh %59 : vector<8x128xf32>
    %61 = arith.negf %59 : vector<8x128xf32>
    %62 = math.exp %61 : vector<8x128xf32>
    %cst_27 = arith.constant 1.000000e+00 : f32
    %63 = vector.broadcast %cst_27 : f32 to vector<8x128xf32>
    %64 = arith.addf %63, %62 : vector<8x128xf32>
    %65 = arith.divf %63, %64 : vector<8x128xf32>
    %66 = arith.select %5, %60, %65 : vector<8x128xi1>, vector<8x128xf32>
    %c64_i32_28 = arith.constant 64 : i32
    %67 = tpu.dynamic_rotate %66 by %c64_i32_28 dim 1 : vector<8x128xf32>, i32 -> vector<8x128xf32>
    %68 = arith.mulf %66, %67 : vector<8x128xf32>
    %c32_i32_29 = arith.constant 32 : i32
    %69 = tpu.dynamic_rotate %68 by %c32_i32_29 dim 1 : vector<8x128xf32>, i32 -> vector<8x128xf32>
    %70 = arith.mulf %66, %31 : vector<8x128xf32>
    %71 = arith.addf %70, %69 : vector<8x128xf32>
    %72 = math.tanh %71 : vector<8x128xf32>
    %c64_i32_30 = arith.constant 64 : i32
    %73 = tpu.dynamic_rotate %72 by %c64_i32_30 dim 1 : vector<8x128xf32>, i32 -> vector<8x128xf32>
    %74 = arith.mulf %66, %73 : vector<8x128xf32>
    %75 = tpu.concatenate %74, %55 in 1 : vector<8x128xf32>, vector<8x128xf32> -> vector<8x256xf32>
    %c0_31 = arith.constant 0 : index
    %c0_32 = arith.constant 0 : index
    %76 = vector.load %arg4[%c0_31, %c0_32] : memref<256x128xf32, #tpu.memory_space<vmem>>, vector<256x128xf32>
    %cst_33 = arith.constant dense<0.000000e+00> : vector<8x128xf32>
    %77 = tpu.matmul %75, %76, %cst_33 {dimension_numbers = #tpu.dot_dimension_numbers<[1], [0], [0], [1], [0, 0, 1, 1], [], []>} : vector<8x256xf32>, vector<256x128xf32>, vector<8x128xf32> -> vector<8x128xf32>
    %c0_34 = arith.constant 0 : index
    %c0_35 = arith.constant 0 : index
    %78 = vector.load %arg5[%c0_34, %c0_35] : memref<1x128xf32, #tpu.memory_space<vmem>>, vector<1x128xf32>
    %79 = vector.broadcast %78 : vector<1x128xf32> to vector<8x128xf32>
    %80 = arith.addf %77, %79 : vector<8x128xf32>
    %81 = math.tanh %80 : vector<8x128xf32>
    %82 = arith.negf %80 : vector<8x128xf32>
    %83 = math.exp %82 : vector<8x128xf32>
    %cst_36 = arith.constant 1.000000e+00 : f32
    %84 = vector.broadcast %cst_36 : f32 to vector<8x128xf32>
    %85 = arith.addf %84, %83 : vector<8x128xf32>
    %86 = arith.divf %84, %85 : vector<8x128xf32>
    %87 = arith.select %5, %81, %86 : vector<8x128xi1>, vector<8x128xf32>
    %c64_i32_37 = arith.constant 64 : i32
    %88 = tpu.dynamic_rotate %87 by %c64_i32_37 dim 1 : vector<8x128xf32>, i32 -> vector<8x128xf32>
    %89 = arith.mulf %87, %88 : vector<8x128xf32>
    %c32_i32_38 = arith.constant 32 : i32
    %90 = tpu.dynamic_rotate %89 by %c32_i32_38 dim 1 : vector<8x128xf32>, i32 -> vector<8x128xf32>
    %91 = arith.mulf %87, %52 : vector<8x128xf32>
    %92 = arith.addf %91, %90 : vector<8x128xf32>
    %93 = math.tanh %92 : vector<8x128xf32>
    %c64_i32_39 = arith.constant 64 : i32
    %94 = tpu.dynamic_rotate %93 by %c64_i32_39 dim 1 : vector<8x128xf32>, i32 -> vector<8x128xf32>
    %95 = arith.mulf %87, %94 : vector<8x128xf32>
    %96 = vector.extract_strided_slice %11 {offsets = [16, 0], sizes = [8, 128], strides = [1, 1]} : vector<64x128xf32> to vector<8x128xf32>
    %c0_40 = arith.constant 0 : index
    %c0_41 = arith.constant 0 : index
    %97 = vector.load %arg2[%c0_40, %c0_41] : memref<128x128xf32, #tpu.memory_space<vmem>>, vector<128x128xf32>
    %cst_42 = arith.constant dense<0.000000e+00> : vector<8x128xf32>
    %98 = tpu.matmul %74, %97, %cst_42 {dimension_numbers = #tpu.dot_dimension_numbers<[1], [0], [0], [1], [0, 0, 1, 1], [], []>} : vector<8x128xf32>, vector<128x128xf32>, vector<8x128xf32> -> vector<8x128xf32>
    %99 = arith.addf %96, %98 : vector<8x128xf32>
    %100 = math.tanh %99 : vector<8x128xf32>
    %101 = arith.negf %99 : vector<8x128xf32>
    %102 = math.exp %101 : vector<8x128xf32>
    %cst_43 = arith.constant 1.000000e+00 : f32
    %103 = vector.broadcast %cst_43 : f32 to vector<8x128xf32>
    %104 = arith.addf %103, %102 : vector<8x128xf32>
    %105 = arith.divf %103, %104 : vector<8x128xf32>
    %106 = arith.select %5, %100, %105 : vector<8x128xi1>, vector<8x128xf32>
    %c64_i32_44 = arith.constant 64 : i32
    %107 = tpu.dynamic_rotate %106 by %c64_i32_44 dim 1 : vector<8x128xf32>, i32 -> vector<8x128xf32>
    %108 = arith.mulf %106, %107 : vector<8x128xf32>
    %c32_i32_45 = arith.constant 32 : i32
    %109 = tpu.dynamic_rotate %108 by %c32_i32_45 dim 1 : vector<8x128xf32>, i32 -> vector<8x128xf32>
    %110 = arith.mulf %106, %71 : vector<8x128xf32>
    %111 = arith.addf %110, %109 : vector<8x128xf32>
    %112 = math.tanh %111 : vector<8x128xf32>
    %c64_i32_46 = arith.constant 64 : i32
    %113 = tpu.dynamic_rotate %112 by %c64_i32_46 dim 1 : vector<8x128xf32>, i32 -> vector<8x128xf32>
    %114 = arith.mulf %106, %113 : vector<8x128xf32>
    %115 = tpu.concatenate %114, %95 in 1 : vector<8x128xf32>, vector<8x128xf32> -> vector<8x256xf32>
    %c0_47 = arith.constant 0 : index
    %c0_48 = arith.constant 0 : index
    %116 = vector.load %arg4[%c0_47, %c0_48] : memref<256x128xf32, #tpu.memory_space<vmem>>, vector<256x128xf32>
    %cst_49 = arith.constant dense<0.000000e+00> : vector<8x128xf32>
    %117 = tpu.matmul %115, %116, %cst_49 {dimension_numbers = #tpu.dot_dimension_numbers<[1], [0], [0], [1], [0, 0, 1, 1], [], []>} : vector<8x256xf32>, vector<256x128xf32>, vector<8x128xf32> -> vector<8x128xf32>
    %c0_50 = arith.constant 0 : index
    %c0_51 = arith.constant 0 : index
    %118 = vector.load %arg5[%c0_50, %c0_51] : memref<1x128xf32, #tpu.memory_space<vmem>>, vector<1x128xf32>
    %119 = vector.broadcast %118 : vector<1x128xf32> to vector<8x128xf32>
    %120 = arith.addf %117, %119 : vector<8x128xf32>
    %121 = math.tanh %120 : vector<8x128xf32>
    %122 = arith.negf %120 : vector<8x128xf32>
    %123 = math.exp %122 : vector<8x128xf32>
    %cst_52 = arith.constant 1.000000e+00 : f32
    %124 = vector.broadcast %cst_52 : f32 to vector<8x128xf32>
    %125 = arith.addf %124, %123 : vector<8x128xf32>
    %126 = arith.divf %124, %125 : vector<8x128xf32>
    %127 = arith.select %5, %121, %126 : vector<8x128xi1>, vector<8x128xf32>
    %c64_i32_53 = arith.constant 64 : i32
    %128 = tpu.dynamic_rotate %127 by %c64_i32_53 dim 1 : vector<8x128xf32>, i32 -> vector<8x128xf32>
    %129 = arith.mulf %127, %128 : vector<8x128xf32>
    %c32_i32_54 = arith.constant 32 : i32
    %130 = tpu.dynamic_rotate %129 by %c32_i32_54 dim 1 : vector<8x128xf32>, i32 -> vector<8x128xf32>
    %131 = arith.mulf %127, %92 : vector<8x128xf32>
    %132 = arith.addf %131, %130 : vector<8x128xf32>
    %133 = math.tanh %132 : vector<8x128xf32>
    %c64_i32_55 = arith.constant 64 : i32
    %134 = tpu.dynamic_rotate %133 by %c64_i32_55 dim 1 : vector<8x128xf32>, i32 -> vector<8x128xf32>
    %135 = arith.mulf %127, %134 : vector<8x128xf32>
    %136 = vector.extract_strided_slice %11 {offsets = [24, 0], sizes = [8, 128], strides = [1, 1]} : vector<64x128xf32> to vector<8x128xf32>
    %c0_56 = arith.constant 0 : index
    %c0_57 = arith.constant 0 : index
    %137 = vector.load %arg2[%c0_56, %c0_57] : memref<128x128xf32, #tpu.memory_space<vmem>>, vector<128x128xf32>
    %cst_58 = arith.constant dense<0.000000e+00> : vector<8x128xf32>
    %138 = tpu.matmul %114, %137, %cst_58 {dimension_numbers = #tpu.dot_dimension_numbers<[1], [0], [0], [1], [0, 0, 1, 1], [], []>} : vector<8x128xf32>, vector<128x128xf32>, vector<8x128xf32> -> vector<8x128xf32>
    %139 = arith.addf %136, %138 : vector<8x128xf32>
    %140 = math.tanh %139 : vector<8x128xf32>
    %141 = arith.negf %139 : vector<8x128xf32>
    %142 = math.exp %141 : vector<8x128xf32>
    %cst_59 = arith.constant 1.000000e+00 : f32
    %143 = vector.broadcast %cst_59 : f32 to vector<8x128xf32>
    %144 = arith.addf %143, %142 : vector<8x128xf32>
    %145 = arith.divf %143, %144 : vector<8x128xf32>
    %146 = arith.select %5, %140, %145 : vector<8x128xi1>, vector<8x128xf32>
    %c64_i32_60 = arith.constant 64 : i32
    %147 = tpu.dynamic_rotate %146 by %c64_i32_60 dim 1 : vector<8x128xf32>, i32 -> vector<8x128xf32>
    %148 = arith.mulf %146, %147 : vector<8x128xf32>
    %c32_i32_61 = arith.constant 32 : i32
    %149 = tpu.dynamic_rotate %148 by %c32_i32_61 dim 1 : vector<8x128xf32>, i32 -> vector<8x128xf32>
    %150 = arith.mulf %146, %111 : vector<8x128xf32>
    %151 = arith.addf %150, %149 : vector<8x128xf32>
    %152 = math.tanh %151 : vector<8x128xf32>
    %c64_i32_62 = arith.constant 64 : i32
    %153 = tpu.dynamic_rotate %152 by %c64_i32_62 dim 1 : vector<8x128xf32>, i32 -> vector<8x128xf32>
    %154 = arith.mulf %146, %153 : vector<8x128xf32>
    %155 = tpu.concatenate %154, %135 in 1 : vector<8x128xf32>, vector<8x128xf32> -> vector<8x256xf32>
    %c0_63 = arith.constant 0 : index
    %c0_64 = arith.constant 0 : index
    %156 = vector.load %arg4[%c0_63, %c0_64] : memref<256x128xf32, #tpu.memory_space<vmem>>, vector<256x128xf32>
    %cst_65 = arith.constant dense<0.000000e+00> : vector<8x128xf32>
    %157 = tpu.matmul %155, %156, %cst_65 {dimension_numbers = #tpu.dot_dimension_numbers<[1], [0], [0], [1], [0, 0, 1, 1], [], []>} : vector<8x256xf32>, vector<256x128xf32>, vector<8x128xf32> -> vector<8x128xf32>
    %c0_66 = arith.constant 0 : index
    %c0_67 = arith.constant 0 : index
    %158 = vector.load %arg5[%c0_66, %c0_67] : memref<1x128xf32, #tpu.memory_space<vmem>>, vector<1x128xf32>
    %159 = vector.broadcast %158 : vector<1x128xf32> to vector<8x128xf32>
    %160 = arith.addf %157, %159 : vector<8x128xf32>
    %161 = math.tanh %160 : vector<8x128xf32>
    %162 = arith.negf %160 : vector<8x128xf32>
    %163 = math.exp %162 : vector<8x128xf32>
    %cst_68 = arith.constant 1.000000e+00 : f32
    %164 = vector.broadcast %cst_68 : f32 to vector<8x128xf32>
    %165 = arith.addf %164, %163 : vector<8x128xf32>
    %166 = arith.divf %164, %165 : vector<8x128xf32>
    %167 = arith.select %5, %161, %166 : vector<8x128xi1>, vector<8x128xf32>
    %c64_i32_69 = arith.constant 64 : i32
    %168 = tpu.dynamic_rotate %167 by %c64_i32_69 dim 1 : vector<8x128xf32>, i32 -> vector<8x128xf32>
    %169 = arith.mulf %167, %168 : vector<8x128xf32>
    %c32_i32_70 = arith.constant 32 : i32
    %170 = tpu.dynamic_rotate %169 by %c32_i32_70 dim 1 : vector<8x128xf32>, i32 -> vector<8x128xf32>
    %171 = arith.mulf %167, %132 : vector<8x128xf32>
    %172 = arith.addf %171, %170 : vector<8x128xf32>
    %173 = math.tanh %172 : vector<8x128xf32>
    %c64_i32_71 = arith.constant 64 : i32
    %174 = tpu.dynamic_rotate %173 by %c64_i32_71 dim 1 : vector<8x128xf32>, i32 -> vector<8x128xf32>
    %175 = arith.mulf %167, %174 : vector<8x128xf32>
    %176 = vector.extract_strided_slice %11 {offsets = [32, 0], sizes = [8, 128], strides = [1, 1]} : vector<64x128xf32> to vector<8x128xf32>
    %c0_72 = arith.constant 0 : index
    %c0_73 = arith.constant 0 : index
    %177 = vector.load %arg2[%c0_72, %c0_73] : memref<128x128xf32, #tpu.memory_space<vmem>>, vector<128x128xf32>
    %cst_74 = arith.constant dense<0.000000e+00> : vector<8x128xf32>
    %178 = tpu.matmul %154, %177, %cst_74 {dimension_numbers = #tpu.dot_dimension_numbers<[1], [0], [0], [1], [0, 0, 1, 1], [], []>} : vector<8x128xf32>, vector<128x128xf32>, vector<8x128xf32> -> vector<8x128xf32>
    %179 = arith.addf %176, %178 : vector<8x128xf32>
    %180 = math.tanh %179 : vector<8x128xf32>
    %181 = arith.negf %179 : vector<8x128xf32>
    %182 = math.exp %181 : vector<8x128xf32>
    %cst_75 = arith.constant 1.000000e+00 : f32
    %183 = vector.broadcast %cst_75 : f32 to vector<8x128xf32>
    %184 = arith.addf %183, %182 : vector<8x128xf32>
    %185 = arith.divf %183, %184 : vector<8x128xf32>
    %186 = arith.select %5, %180, %185 : vector<8x128xi1>, vector<8x128xf32>
    %c64_i32_76 = arith.constant 64 : i32
    %187 = tpu.dynamic_rotate %186 by %c64_i32_76 dim 1 : vector<8x128xf32>, i32 -> vector<8x128xf32>
    %188 = arith.mulf %186, %187 : vector<8x128xf32>
    %c32_i32_77 = arith.constant 32 : i32
    %189 = tpu.dynamic_rotate %188 by %c32_i32_77 dim 1 : vector<8x128xf32>, i32 -> vector<8x128xf32>
    %190 = arith.mulf %186, %151 : vector<8x128xf32>
    %191 = arith.addf %190, %189 : vector<8x128xf32>
    %192 = math.tanh %191 : vector<8x128xf32>
    %c64_i32_78 = arith.constant 64 : i32
    %193 = tpu.dynamic_rotate %192 by %c64_i32_78 dim 1 : vector<8x128xf32>, i32 -> vector<8x128xf32>
    %194 = arith.mulf %186, %193 : vector<8x128xf32>
    %195 = tpu.concatenate %194, %175 in 1 : vector<8x128xf32>, vector<8x128xf32> -> vector<8x256xf32>
    %c0_79 = arith.constant 0 : index
    %c0_80 = arith.constant 0 : index
    %196 = vector.load %arg4[%c0_79, %c0_80] : memref<256x128xf32, #tpu.memory_space<vmem>>, vector<256x128xf32>
    %cst_81 = arith.constant dense<0.000000e+00> : vector<8x128xf32>
    %197 = tpu.matmul %195, %196, %cst_81 {dimension_numbers = #tpu.dot_dimension_numbers<[1], [0], [0], [1], [0, 0, 1, 1], [], []>} : vector<8x256xf32>, vector<256x128xf32>, vector<8x128xf32> -> vector<8x128xf32>
    %c0_82 = arith.constant 0 : index
    %c0_83 = arith.constant 0 : index
    %198 = vector.load %arg5[%c0_82, %c0_83] : memref<1x128xf32, #tpu.memory_space<vmem>>, vector<1x128xf32>
    %199 = vector.broadcast %198 : vector<1x128xf32> to vector<8x128xf32>
    %200 = arith.addf %197, %199 : vector<8x128xf32>
    %201 = math.tanh %200 : vector<8x128xf32>
    %202 = arith.negf %200 : vector<8x128xf32>
    %203 = math.exp %202 : vector<8x128xf32>
    %cst_84 = arith.constant 1.000000e+00 : f32
    %204 = vector.broadcast %cst_84 : f32 to vector<8x128xf32>
    %205 = arith.addf %204, %203 : vector<8x128xf32>
    %206 = arith.divf %204, %205 : vector<8x128xf32>
    %207 = arith.select %5, %201, %206 : vector<8x128xi1>, vector<8x128xf32>
    %c64_i32_85 = arith.constant 64 : i32
    %208 = tpu.dynamic_rotate %207 by %c64_i32_85 dim 1 : vector<8x128xf32>, i32 -> vector<8x128xf32>
    %209 = arith.mulf %207, %208 : vector<8x128xf32>
    %c32_i32_86 = arith.constant 32 : i32
    %210 = tpu.dynamic_rotate %209 by %c32_i32_86 dim 1 : vector<8x128xf32>, i32 -> vector<8x128xf32>
    %211 = arith.mulf %207, %172 : vector<8x128xf32>
    %212 = arith.addf %211, %210 : vector<8x128xf32>
    %213 = math.tanh %212 : vector<8x128xf32>
    %c64_i32_87 = arith.constant 64 : i32
    %214 = tpu.dynamic_rotate %213 by %c64_i32_87 dim 1 : vector<8x128xf32>, i32 -> vector<8x128xf32>
    %215 = arith.mulf %207, %214 : vector<8x128xf32>
    %216 = vector.extract_strided_slice %11 {offsets = [40, 0], sizes = [8, 128], strides = [1, 1]} : vector<64x128xf32> to vector<8x128xf32>
    %c0_88 = arith.constant 0 : index
    %c0_89 = arith.constant 0 : index
    %217 = vector.load %arg2[%c0_88, %c0_89] : memref<128x128xf32, #tpu.memory_space<vmem>>, vector<128x128xf32>
    %cst_90 = arith.constant dense<0.000000e+00> : vector<8x128xf32>
    %218 = tpu.matmul %194, %217, %cst_90 {dimension_numbers = #tpu.dot_dimension_numbers<[1], [0], [0], [1], [0, 0, 1, 1], [], []>} : vector<8x128xf32>, vector<128x128xf32>, vector<8x128xf32> -> vector<8x128xf32>
    %219 = arith.addf %216, %218 : vector<8x128xf32>
    %220 = math.tanh %219 : vector<8x128xf32>
    %221 = arith.negf %219 : vector<8x128xf32>
    %222 = math.exp %221 : vector<8x128xf32>
    %cst_91 = arith.constant 1.000000e+00 : f32
    %223 = vector.broadcast %cst_91 : f32 to vector<8x128xf32>
    %224 = arith.addf %223, %222 : vector<8x128xf32>
    %225 = arith.divf %223, %224 : vector<8x128xf32>
    %226 = arith.select %5, %220, %225 : vector<8x128xi1>, vector<8x128xf32>
    %c64_i32_92 = arith.constant 64 : i32
    %227 = tpu.dynamic_rotate %226 by %c64_i32_92 dim 1 : vector<8x128xf32>, i32 -> vector<8x128xf32>
    %228 = arith.mulf %226, %227 : vector<8x128xf32>
    %c32_i32_93 = arith.constant 32 : i32
    %229 = tpu.dynamic_rotate %228 by %c32_i32_93 dim 1 : vector<8x128xf32>, i32 -> vector<8x128xf32>
    %230 = arith.mulf %226, %191 : vector<8x128xf32>
    %231 = arith.addf %230, %229 : vector<8x128xf32>
    %232 = math.tanh %231 : vector<8x128xf32>
    %c64_i32_94 = arith.constant 64 : i32
    %233 = tpu.dynamic_rotate %232 by %c64_i32_94 dim 1 : vector<8x128xf32>, i32 -> vector<8x128xf32>
    %234 = arith.mulf %226, %233 : vector<8x128xf32>
    %235 = tpu.concatenate %234, %215 in 1 : vector<8x128xf32>, vector<8x128xf32> -> vector<8x256xf32>
    %c0_95 = arith.constant 0 : index
    %c0_96 = arith.constant 0 : index
    %236 = vector.load %arg4[%c0_95, %c0_96] : memref<256x128xf32, #tpu.memory_space<vmem>>, vector<256x128xf32>
    %cst_97 = arith.constant dense<0.000000e+00> : vector<8x128xf32>
    %237 = tpu.matmul %235, %236, %cst_97 {dimension_numbers = #tpu.dot_dimension_numbers<[1], [0], [0], [1], [0, 0, 1, 1], [], []>} : vector<8x256xf32>, vector<256x128xf32>, vector<8x128xf32> -> vector<8x128xf32>
    %c0_98 = arith.constant 0 : index
    %c0_99 = arith.constant 0 : index
    %238 = vector.load %arg5[%c0_98, %c0_99] : memref<1x128xf32, #tpu.memory_space<vmem>>, vector<1x128xf32>
    %239 = vector.broadcast %238 : vector<1x128xf32> to vector<8x128xf32>
    %240 = arith.addf %237, %239 : vector<8x128xf32>
    %241 = math.tanh %240 : vector<8x128xf32>
    %242 = arith.negf %240 : vector<8x128xf32>
    %243 = math.exp %242 : vector<8x128xf32>
    %cst_100 = arith.constant 1.000000e+00 : f32
    %244 = vector.broadcast %cst_100 : f32 to vector<8x128xf32>
    %245 = arith.addf %244, %243 : vector<8x128xf32>
    %246 = arith.divf %244, %245 : vector<8x128xf32>
    %247 = arith.select %5, %241, %246 : vector<8x128xi1>, vector<8x128xf32>
    %c64_i32_101 = arith.constant 64 : i32
    %248 = tpu.dynamic_rotate %247 by %c64_i32_101 dim 1 : vector<8x128xf32>, i32 -> vector<8x128xf32>
    %249 = arith.mulf %247, %248 : vector<8x128xf32>
    %c32_i32_102 = arith.constant 32 : i32
    %250 = tpu.dynamic_rotate %249 by %c32_i32_102 dim 1 : vector<8x128xf32>, i32 -> vector<8x128xf32>
    %251 = arith.mulf %247, %212 : vector<8x128xf32>
    %252 = arith.addf %251, %250 : vector<8x128xf32>
    %253 = math.tanh %252 : vector<8x128xf32>
    %c64_i32_103 = arith.constant 64 : i32
    %254 = tpu.dynamic_rotate %253 by %c64_i32_103 dim 1 : vector<8x128xf32>, i32 -> vector<8x128xf32>
    %255 = arith.mulf %247, %254 : vector<8x128xf32>
    %256 = vector.extract_strided_slice %11 {offsets = [48, 0], sizes = [8, 128], strides = [1, 1]} : vector<64x128xf32> to vector<8x128xf32>
    %c0_104 = arith.constant 0 : index
    %c0_105 = arith.constant 0 : index
    %257 = vector.load %arg2[%c0_104, %c0_105] : memref<128x128xf32, #tpu.memory_space<vmem>>, vector<128x128xf32>
    %cst_106 = arith.constant dense<0.000000e+00> : vector<8x128xf32>
    %258 = tpu.matmul %234, %257, %cst_106 {dimension_numbers = #tpu.dot_dimension_numbers<[1], [0], [0], [1], [0, 0, 1, 1], [], []>} : vector<8x128xf32>, vector<128x128xf32>, vector<8x128xf32> -> vector<8x128xf32>
    %259 = arith.addf %256, %258 : vector<8x128xf32>
    %260 = math.tanh %259 : vector<8x128xf32>
    %261 = arith.negf %259 : vector<8x128xf32>
    %262 = math.exp %261 : vector<8x128xf32>
    %cst_107 = arith.constant 1.000000e+00 : f32
    %263 = vector.broadcast %cst_107 : f32 to vector<8x128xf32>
    %264 = arith.addf %263, %262 : vector<8x128xf32>
    %265 = arith.divf %263, %264 : vector<8x128xf32>
    %266 = arith.select %5, %260, %265 : vector<8x128xi1>, vector<8x128xf32>
    %c64_i32_108 = arith.constant 64 : i32
    %267 = tpu.dynamic_rotate %266 by %c64_i32_108 dim 1 : vector<8x128xf32>, i32 -> vector<8x128xf32>
    %268 = arith.mulf %266, %267 : vector<8x128xf32>
    %c32_i32_109 = arith.constant 32 : i32
    %269 = tpu.dynamic_rotate %268 by %c32_i32_109 dim 1 : vector<8x128xf32>, i32 -> vector<8x128xf32>
    %270 = arith.mulf %266, %231 : vector<8x128xf32>
    %271 = arith.addf %270, %269 : vector<8x128xf32>
    %272 = math.tanh %271 : vector<8x128xf32>
    %c64_i32_110 = arith.constant 64 : i32
    %273 = tpu.dynamic_rotate %272 by %c64_i32_110 dim 1 : vector<8x128xf32>, i32 -> vector<8x128xf32>
    %274 = arith.mulf %266, %273 : vector<8x128xf32>
    %275 = tpu.concatenate %274, %255 in 1 : vector<8x128xf32>, vector<8x128xf32> -> vector<8x256xf32>
    %c0_111 = arith.constant 0 : index
    %c0_112 = arith.constant 0 : index
    %276 = vector.load %arg4[%c0_111, %c0_112] : memref<256x128xf32, #tpu.memory_space<vmem>>, vector<256x128xf32>
    %cst_113 = arith.constant dense<0.000000e+00> : vector<8x128xf32>
    %277 = tpu.matmul %275, %276, %cst_113 {dimension_numbers = #tpu.dot_dimension_numbers<[1], [0], [0], [1], [0, 0, 1, 1], [], []>} : vector<8x256xf32>, vector<256x128xf32>, vector<8x128xf32> -> vector<8x128xf32>
    %c0_114 = arith.constant 0 : index
    %c0_115 = arith.constant 0 : index
    %278 = vector.load %arg5[%c0_114, %c0_115] : memref<1x128xf32, #tpu.memory_space<vmem>>, vector<1x128xf32>
    %279 = vector.broadcast %278 : vector<1x128xf32> to vector<8x128xf32>
    %280 = arith.addf %277, %279 : vector<8x128xf32>
    %281 = math.tanh %280 : vector<8x128xf32>
    %282 = arith.negf %280 : vector<8x128xf32>
    %283 = math.exp %282 : vector<8x128xf32>
    %cst_116 = arith.constant 1.000000e+00 : f32
    %284 = vector.broadcast %cst_116 : f32 to vector<8x128xf32>
    %285 = arith.addf %284, %283 : vector<8x128xf32>
    %286 = arith.divf %284, %285 : vector<8x128xf32>
    %287 = arith.select %5, %281, %286 : vector<8x128xi1>, vector<8x128xf32>
    %c64_i32_117 = arith.constant 64 : i32
    %288 = tpu.dynamic_rotate %287 by %c64_i32_117 dim 1 : vector<8x128xf32>, i32 -> vector<8x128xf32>
    %289 = arith.mulf %287, %288 : vector<8x128xf32>
    %c32_i32_118 = arith.constant 32 : i32
    %290 = tpu.dynamic_rotate %289 by %c32_i32_118 dim 1 : vector<8x128xf32>, i32 -> vector<8x128xf32>
    %291 = arith.mulf %287, %252 : vector<8x128xf32>
    %292 = arith.addf %291, %290 : vector<8x128xf32>
    %293 = math.tanh %292 : vector<8x128xf32>
    %c64_i32_119 = arith.constant 64 : i32
    %294 = tpu.dynamic_rotate %293 by %c64_i32_119 dim 1 : vector<8x128xf32>, i32 -> vector<8x128xf32>
    %295 = arith.mulf %287, %294 : vector<8x128xf32>
    %296 = vector.extract_strided_slice %11 {offsets = [56, 0], sizes = [8, 128], strides = [1, 1]} : vector<64x128xf32> to vector<8x128xf32>
    %c0_120 = arith.constant 0 : index
    %c0_121 = arith.constant 0 : index
    %297 = vector.load %arg2[%c0_120, %c0_121] : memref<128x128xf32, #tpu.memory_space<vmem>>, vector<128x128xf32>
    %cst_122 = arith.constant dense<0.000000e+00> : vector<8x128xf32>
    %298 = tpu.matmul %274, %297, %cst_122 {dimension_numbers = #tpu.dot_dimension_numbers<[1], [0], [0], [1], [0, 0, 1, 1], [], []>} : vector<8x128xf32>, vector<128x128xf32>, vector<8x128xf32> -> vector<8x128xf32>
    %299 = arith.addf %296, %298 : vector<8x128xf32>
    %300 = math.tanh %299 : vector<8x128xf32>
    %301 = arith.negf %299 : vector<8x128xf32>
    %302 = math.exp %301 : vector<8x128xf32>
    %cst_123 = arith.constant 1.000000e+00 : f32
    %303 = vector.broadcast %cst_123 : f32 to vector<8x128xf32>
    %304 = arith.addf %303, %302 : vector<8x128xf32>
    %305 = arith.divf %303, %304 : vector<8x128xf32>
    %306 = arith.select %5, %300, %305 : vector<8x128xi1>, vector<8x128xf32>
    %c64_i32_124 = arith.constant 64 : i32
    %307 = tpu.dynamic_rotate %306 by %c64_i32_124 dim 1 : vector<8x128xf32>, i32 -> vector<8x128xf32>
    %308 = arith.mulf %306, %307 : vector<8x128xf32>
    %c32_i32_125 = arith.constant 32 : i32
    %309 = tpu.dynamic_rotate %308 by %c32_i32_125 dim 1 : vector<8x128xf32>, i32 -> vector<8x128xf32>
    %310 = arith.mulf %306, %271 : vector<8x128xf32>
    %311 = arith.addf %310, %309 : vector<8x128xf32>
    %312 = math.tanh %311 : vector<8x128xf32>
    %c64_i32_126 = arith.constant 64 : i32
    %313 = tpu.dynamic_rotate %312 by %c64_i32_126 dim 1 : vector<8x128xf32>, i32 -> vector<8x128xf32>
    %314 = arith.mulf %306, %313 : vector<8x128xf32>
    %315 = tpu.concatenate %314, %295 in 1 : vector<8x128xf32>, vector<8x128xf32> -> vector<8x256xf32>
    %c0_127 = arith.constant 0 : index
    %c0_128 = arith.constant 0 : index
    %316 = vector.load %arg4[%c0_127, %c0_128] : memref<256x128xf32, #tpu.memory_space<vmem>>, vector<256x128xf32>
    %cst_129 = arith.constant dense<0.000000e+00> : vector<8x128xf32>
    %317 = tpu.matmul %315, %316, %cst_129 {dimension_numbers = #tpu.dot_dimension_numbers<[1], [0], [0], [1], [0, 0, 1, 1], [], []>} : vector<8x256xf32>, vector<256x128xf32>, vector<8x128xf32> -> vector<8x128xf32>
    %c0_130 = arith.constant 0 : index
    %c0_131 = arith.constant 0 : index
    %318 = vector.load %arg5[%c0_130, %c0_131] : memref<1x128xf32, #tpu.memory_space<vmem>>, vector<1x128xf32>
    %319 = vector.broadcast %318 : vector<1x128xf32> to vector<8x128xf32>
    %320 = arith.addf %317, %319 : vector<8x128xf32>
    %321 = math.tanh %320 : vector<8x128xf32>
    %322 = arith.negf %320 : vector<8x128xf32>
    %323 = math.exp %322 : vector<8x128xf32>
    %cst_132 = arith.constant 1.000000e+00 : f32
    %324 = vector.broadcast %cst_132 : f32 to vector<8x128xf32>
    %325 = arith.addf %324, %323 : vector<8x128xf32>
    %326 = arith.divf %324, %325 : vector<8x128xf32>
    %327 = arith.select %5, %321, %326 : vector<8x128xi1>, vector<8x128xf32>
    %c64_i32_133 = arith.constant 64 : i32
    %328 = tpu.dynamic_rotate %327 by %c64_i32_133 dim 1 : vector<8x128xf32>, i32 -> vector<8x128xf32>
    %329 = arith.mulf %327, %328 : vector<8x128xf32>
    %c32_i32_134 = arith.constant 32 : i32
    %330 = tpu.dynamic_rotate %329 by %c32_i32_134 dim 1 : vector<8x128xf32>, i32 -> vector<8x128xf32>
    %331 = arith.mulf %327, %292 : vector<8x128xf32>
    %332 = arith.addf %331, %330 : vector<8x128xf32>
    %333 = math.tanh %332 : vector<8x128xf32>
    %c64_i32_135 = arith.constant 64 : i32
    %334 = tpu.dynamic_rotate %333 by %c64_i32_135 dim 1 : vector<8x128xf32>, i32 -> vector<8x128xf32>
    %335 = arith.mulf %327, %334 : vector<8x128xf32>
    %c0_136 = arith.constant 0 : index
    %c0_137 = arith.constant 0 : index
    %336 = vector.load %arg6[%c0_136, %c0_137] : memref<128x128xf32, #tpu.memory_space<vmem>>, vector<128x128xf32>
    %cst_138 = arith.constant dense<0.000000e+00> : vector<8x128xf32>
    %337 = tpu.matmul %335, %336, %cst_138 {dimension_numbers = #tpu.dot_dimension_numbers<[1], [0], [0], [1], [0, 0, 1, 1], [], []>} : vector<8x128xf32>, vector<128x128xf32>, vector<8x128xf32> -> vector<8x128xf32>
    %c0_139 = arith.constant 0 : index
    %c0_140 = arith.constant 0 : index
    %338 = vector.load %arg7[%c0_139, %c0_140] : memref<1x128xf32, #tpu.memory_space<vmem>>, vector<1x128xf32>
    %339 = vector.broadcast %338 : vector<1x128xf32> to vector<8x128xf32>
    %340 = arith.addf %337, %339 : vector<8x128xf32>
    %341 = tpu.iota {dimensions = array<i32: 1>} : vector<8x128xi32>
    %c4_i32 = arith.constant 4 : i32
    %342 = vector.broadcast %c4_i32 : i32 to vector<8x128xi32>
    %343 = arith.cmpi sge, %341, %342 : vector<8x128xi32>
    %c8_i32 = arith.constant 8 : i32
    %344 = vector.broadcast %c8_i32 : i32 to vector<8x128xi32>
    %345 = arith.cmpi slt, %341, %344 : vector<8x128xi32>
    %346 = arith.andi %343, %345 : vector<8x128xi1>
    %347 = math.exp %340 : vector<8x128xf32>
    %348 = arith.select %346, %347, %340 : vector<8x128xi1>, vector<8x128xf32>
    %c0_141 = arith.constant 0 : index
    %c0_142 = arith.constant 0 : index
    %349 = vector.load %arg8[%c0_141, %c0_142] : memref<8x128xf32, #tpu.memory_space<vmem>>, vector<8x128xf32>
    tpu.vector_store %arg8[%c0_141, %c0_142], %348 {strides = array<i32>} : memref<8x128xf32, #tpu.memory_space<vmem>>, vector<8x128xf32>,
    return
  }
}

</mosaic_0001>

<bundles_post_ra>
// kernel: tpu_custom_call.1
= control target key start
LH: loop header
LB: loop body
LE: loop exit
PB: predicated region body
PF: predicated region fallthrough
CT: control target
= control target key end

     0   :  { %13 = vsyncpa [#allocation3], 0  ;;  %s2492_s0 = inlined_call_operand.hbm [shape: f32[64,128], index: 0, kind: input, shape index: {}]   ;;  %s2493_s1 = inlined_call_operand.hbm [shape: f32[128,128], index: 1, kind: input, shape index: {}]   ;;  %s2494_s2 = inlined_call_operand.hbm [shape: f32[128,128], index: 2, kind: input, shape index: {}]   ;;  %s2495_s3 = inlined_call_operand.vmem [shape: f32[1,128], index: 3, kind: input, shape index: {}]   ;;  %s2496_s4 = inlined_call_operand.hbm [shape: f32[256,128], index: 4, kind: input, shape index: {}]   ;;  %s2497_s5 = inlined_call_operand.vmem [shape: f32[1,128], index: 5, kind: input, shape index: {}]   ;;  %s2498_s6 = inlined_call_operand.hbm [shape: f32[128,128], index: 6, kind: input, shape index: {}]   ;;  %s2499_s7 = inlined_call_operand.vmem [shape: f32[1,128], index: 7, kind: input, shape index: {}]   ;;  %s2500_s8 = inlined_call_operand.hbm [shape: f32[8,128], index: 8, kind: output, shape index: {}]  }
   0x1   :  { %14 = vsyncpa [#allocation6], 0 }
   0x2   :  { %15 = vsyncpa [#allocation9], 0 }
   0x3   :  { %16 = vsyncpa [#allocation4], 0  ;;  %s34_s29 = sshll.u32 %s2493_s1, 4  ;;  %s1662_s30 = smov [#allocation5]   ;;  %s35_s29 = int_to_ptr.hbm [resolvable:$true] %s34_s29 }
   0x4   :  { %s36_s9 = sshll.u32 %s1662_s30, 4  ;;  %s62_s12 = sshll.u32 %s2496_s4, 4  ;;  %s37_s9 = int_to_ptr.vmem [resolvable:$true] %s36_s9  ;;  %s63_s12 = int_to_ptr.hbm [resolvable:$true] %s62_s12 }
   0x5   :  { %s1663_s13 = smov 128   ;;  %s1664_s14 = smov 8  }
   0x6   :  { %42 = dma.hbm_to_vmem [thread:$0]  %s35_s29, 2048, %s37_s9, [#allocation6], %s1663_s13, %s1663_s13, %s1664_s14  }
   0x7   :  { %s1665_s15 = smov [#allocation8]   ;;  %s21_s19 = sshll.u32 %s2492_s0, 4  ;;  %s22_s19 = int_to_ptr.hbm [resolvable:$true] %s21_s19 }
   0x8   :  { %s64_s16 = sshll.u32 %s1665_s15, 4  ;;  %s47_s21 = sshll.u32 %s2494_s2, 4  ;;  %s65_s16 = int_to_ptr.vmem [resolvable:$true] %s64_s16  ;;  %s48_s21 = int_to_ptr.hbm [resolvable:$true] %s47_s21 }
   0x9   :  { %70 = dma.hbm_to_vmem [thread:$0]  %s63_s12, 4096, %s65_s16, [#allocation9], %s1663_s13, %s1663_s13, %s1664_s14  }
   0xa   :  { %s1666_s22 = smov [#allocation2]   ;;  %s1667_s4 = smov [#allocation7]  }
   0xb   :  { %s23_s23 = sshll.u32 %s1666_s22, 4  ;;  %s49_s24 = sshll.u32 %s1667_s4, 4  ;;  %s24_s23 = int_to_ptr.vmem [resolvable:$true] %s23_s23  ;;  %s50_s24 = int_to_ptr.vmem [resolvable:$true] %s49_s24 }
   0xc   :  { %29 = dma.hbm_to_vmem [thread:$0]  %s22_s19, 1024, %s24_s23, [#allocation3], %s1663_s13, %s1663_s13, %s1664_s14  }
   0xd   :  { %s77_s27 = sshll.u32 %s2498_s6, 4  ;;  %s1668_s0 = smov [#allocation10]   ;;  %s78_s27 = int_to_ptr.hbm [resolvable:$true] %s77_s27 }
   0xe   :  { %55 = dma.hbm_to_vmem [thread:$0]  %s48_s21, 2048, %s50_s24, [#allocation6], %s1663_s13, %s1663_s13, %s1664_s14  }
   0xf   :  { %s79_s28 = sshll.u32 %s1668_s0, 4  ;;  %s80_s28 = int_to_ptr.vmem [resolvable:$true] %s79_s28 }
  0x10   :  { %85 = dma.hbm_to_vmem [thread:$0]  %s78_s27, 2048, %s80_s28, [#allocation9], %s1663_s13, %s1663_s13, %s1664_s14  }
  0x11   :  { %1654 = dma.done.wait [#allocation3], 1024  }
  0x12   :  { %1655 = vsyncadd [#allocation3], 4294966272 }
  0x13   :  { %1656 = dma.done.wait [#allocation6], 4096  }
  0x14   :  { %1657 = vsyncadd [#allocation6], 4294963200 }
  0x15   :  { %1658 = dma.done.wait [#allocation9], 6144  }
  0x16   :  { %1659 = vsyncadd [#allocation9], 4294961152  ;;  %v136_v0 = vld [vmem:[#allocation5 + $0x78] sm:$0xff]  ;;  %v135_v1 = vld [vmem:[#allocation5 + $0x70] sm:$0xff]  ;;  %v1669_v33 = vmov 0.0   ;;  %v108_v42 = vlaneseq  ;;  %s1670_s29 = smov 64  }
  0x17   :  { %v1733_v2 = vld [vmem:[#allocation7 + $0x78] sm:$0xff]  ;;  %141 = vmatpush.msra.mxu0 %v136_v0  ;;  %v1736_v3 = vld [vmem:[#allocation7 + $0x70] sm:$0xff]  ;;  %v134_v4 = vld [vmem:[#allocation5 + $0x68] sm:$0xff]  ;;  %s1671_s30 = smov 32   ;;  %s1672_s15 = smov [#allocation11]  }
  0x18   :  { %198 = vmatpush.msra.mxu1 %v1733_v2  ;;  %v1738_v5 = vld [vmem:[#allocation7 + $0x68] sm:$0xff]  ;;  %v133_v6 = vld [vmem:[#allocation5 + $0x60] sm:$0xff]  ;;  %v132_v8 = vld [vmem:[#allocation5 + $0x58] sm:$0xff]  ;;  %v1820_v44 = vand.u32 127, %v108_v42  ;;  %s1286_s16 = sshll.u32 %s1672_s15, 4  ;;  %s1288_s19 = sshll.u32 %s2500_s8, 4  ;;  %s1287_s16 = int_to_ptr.vmem [resolvable:$true] %s1286_s16  ;;  %s1289_s19 = int_to_ptr.hbm [resolvable:$true] %s1288_s19 }
  0x19   :  { %142 = vmatpush.msra.mxu0 %v135_v1  ;;  %v1741_v7 = vld [vmem:[#allocation7 + $0x60] sm:$0xff]  ;;  %v1744_v9 = vld [vmem:[#allocation7 + $0x58] sm:$0xff]  ;;  %v131_v10 = vld [vmem:[#allocation5 + $0x50] sm:$0xff] }
  0x1a   :  { %199 = vmatpush.msra.mxu1 %v1736_v3  ;;  %v1747_v11 = vld [vmem:[#allocation7 + $0x50] sm:$0xff]  ;;  %v130_v12 = vld [vmem:[#allocation5 + $0x48] sm:$0xff]  ;;  %v129_v14 = vld [vmem:[#allocation5 + $0x40] sm:$0xff]  ;;  %2520 = vst [vmem:[#allocation19_spill] sm:$0xff] %v1820_v44  ;;  %vm110_vm0 = vcmp.ge.s32.totalorder %v1820_v44, 64  ;;  %vm111_vm1 = vcmp.lt.s32.totalorder %v1820_v44, 96 }
  0x1b   :  { %143 = vmatpush.msra.mxu0 %v134_v4  ;;  %v1750_v13 = vld [vmem:[#allocation7 + $0x48] sm:$0xff]  ;;  %v1753_v15 = vld [vmem:[#allocation7 + $0x40] sm:$0xff]  ;;  %v128_v16 = vld [vmem:[#allocation5 + $0x38] sm:$0xff] }
  0x1c   :  { %200 = vmatpush.msra.mxu1 %v1738_v5  ;;  %v1756_v17 = vld [vmem:[#allocation7 + $0x38] sm:$0xff]  ;;  %v127_v18 = vld [vmem:[#allocation5 + $0x30] sm:$0xff]  ;;  %v126_v20 = vld [vmem:[#allocation5 + $0x28] sm:$0xff] }
  0x1d   :  { %144 = vmatpush.msra.mxu0 %v133_v6  ;;  %v1759_v19 = vld [vmem:[#allocation7 + $0x30] sm:$0xff]  ;;  %v1762_v21 = vld [vmem:[#allocation7 + $0x28] sm:$0xff]  ;;  %v125_v22 = vld [vmem:[#allocation5 + $0x20] sm:$0xff] }
  0x1e   :  { %201 = vmatpush.msra.mxu1 %v1741_v7  ;;  %v1765_v23 = vld [vmem:[#allocation7 + $0x20] sm:$0xff]  ;;  %v124_v24 = vld [vmem:[#allocation5 + $0x18] sm:$0xff]  ;;  %v123_v26 = vld [vmem:[#allocation5 + $0x10] sm:$0xff] }
  0x1f   :  { %145 = vmatpush.msra.mxu0 %v132_v8  ;;  %v1768_v25 = vld [vmem:[#allocation7 + $0x18] sm:$0xff]  ;;  %v1771_v27 = vld [vmem:[#allocation7 + $0x10] sm:$0xff]  ;;  %v122_v28 = vld [vmem:[#allocation5 + $0x8] sm:$0xff] }
  0x20   :  { %202 = vmatpush.msra.mxu1 %v1744_v9  ;;  %v1774_v29 = vld [vmem:[#allocation7 + $0x8] sm:$0xff]  ;;  %v121_v30 = vld [vmem:[#allocation5] sm:$0xff]  ;;  %vm1824_vm3 = vmand %vm110_vm0, %vm111_vm1 }
  0x21   :  { %146 = vmatpush.msra.mxu0 %v131_v10  ;;  %2517 = vst [vmem:[#allocation16_spill] sm:$0xff] %v1774_v29  ;;  %v1777_v31 = vld [vmem:[#allocation7] sm:$0xff]  ;;  %v1836_v59 = vld [vmem:[#allocation8 + $0x78] sm:$0xff]  ;;  %v1838_v60 = vld [vmem:[#allocation8 + $0x70] sm:$0xff] }
  0x22   :  { %203 = vmatpush.msra.mxu1 %v1747_v11  ;;  %2518 = vst [vmem:[#allocation17_spill] sm:$0xff] %v1777_v31  ;;  %v113_v32 = vld [vmem:[#allocation2] sm:$0xff]  ;;  %v1840_v61 = vld [vmem:[#allocation8 + $0xf8] sm:$0xff]  ;;  %287 = vmatpush.msra.mxu2 %v1836_v59  ;;  %v1844_v62 = vld [vmem:[#allocation8 + $0xf0] sm:$0xff] }
  0x23   :  { %147 = vmatpush.msra.mxu0 %v130_v12  ;;  %v1817_v34 = vld [vmem:[%s2495_s3] ss:$0 sm:$0xff]  ;;  %307 = vmatpush.msra.mxu3 %v1840_v61  ;;  %v1846_v63 = vld [vmem:[#allocation8 + $0x68] sm:$0xff]  ;;  %v1862_v6 = vld [vmem:[#allocation8 + $0x58] sm:$0xff] }
  0x24   :  { %204 = vmatpush.msra.mxu1 %v1750_v13  ;;  %2519 = vst [vmem:[#allocation18_spill] sm:$0xff] %v1817_v34  ;;  %v1848_v0 = vld [vmem:[#allocation8 + $0xe8] sm:$0xff]  ;;  %288 = vmatpush.msra.mxu2 %v1838_v60  ;;  %v1854_v1 = vld [vmem:[#allocation8 + $0x60] sm:$0xff]  ;;  %v1864_v8 = vld [vmem:[#allocation8 + $0xd8] sm:$0xff] }
  0x25   :  { %148 = vmatpush.msra.mxu0 %v129_v14  ;;  %308 = vmatpush.msra.mxu3 %v1844_v62  ;;  %v1856_v4 = vld [vmem:[#allocation8 + $0xe0] sm:$0xff]  ;;  %v1870_v10 = vld [vmem:[#allocation8 + $0x50] sm:$0xff]  ;;  %v1878_v14 = vld [vmem:[#allocation8 + $0x48] sm:$0xff] }
  0x26   :  { %205 = vmatpush.msra.mxu1 %v1753_v15  ;;  %289 = vmatpush.msra.mxu2 %v1846_v63  ;;  %v1872_v12 = vld [vmem:[#allocation8 + $0xd0] sm:$0xff]  ;;  %v1242_v50 = vld [vmem:[#allocation10 + $0x40] sm:$0xff] }
  0x27   :  { %149 = vmatpush.msra.mxu0 %v128_v16  ;;  %309 = vmatpush.msra.mxu3 %v1848_v0  ;;  %v1880_v16 = vld [vmem:[#allocation8 + $0xc8] sm:$0xff]  ;;  %v1937_v42 = vld [vmem:[#allocation8 + $0x10] sm:$0xff] }
  0x28   :  { %206 = vmatpush.msra.mxu1 %v1756_v17  ;;  %290 = vmatpush.msra.mxu2 %v1854_v1 }
  0x29   :  { %150 = vmatpush.msra.mxu0 %v127_v18  ;;  %310 = vmatpush.msra.mxu3 %v1856_v4  ;;  %v1886_v18 = vld [vmem:[#allocation8 + $0x40] sm:$0xff] }
  0x2a   :  { %207 = vmatpush.msra.mxu1 %v1759_v19  ;;  %291 = vmatpush.msra.mxu2 %v1862_v6 }
  0x2b   :  { %151 = vmatpush.msra.mxu0 %v126_v20  ;;  %311 = vmatpush.msra.mxu3 %v1864_v8  ;;  %v1888_v20 = vld [vmem:[#allocation8 + $0xc0] sm:$0xff] }
  0x2c   :  { %208 = vmatpush.msra.mxu1 %v1762_v21  ;;  %292 = vmatpush.msra.mxu2 %v1870_v10 }
  0x2d   :  { %152 = vmatpush.msra.mxu0 %v125_v22  ;;  %312 = vmatpush.msra.mxu3 %v1872_v12  ;;  %v1894_v22 = vld [vmem:[#allocation8 + $0x38] sm:$0xff] }
  0x2e   :  { %209 = vmatpush.msra.mxu1 %v1765_v23  ;;  %293 = vmatpush.msra.mxu2 %v1878_v14 }
  0x2f   :  { %153 = vmatpush.msra.mxu0 %v124_v24  ;;  %313 = vmatpush.msra.mxu3 %v1880_v16  ;;  %v1896_v24 = vld [vmem:[#allocation8 + $0xb8] sm:$0xff] }
  0x30   :  { %210 = vmatpush.msra.mxu1 %v1768_v25  ;;  %294 = vmatpush.msra.mxu2 %v1886_v18 }
  0x31   :  { %154 = vmatpush.msra.mxu0 %v123_v26  ;;  %314 = vmatpush.msra.mxu3 %v1888_v20  ;;  %v1902_v26 = vld [vmem:[#allocation8 + $0x30] sm:$0xff] }
  0x32   :  { %211 = vmatpush.msra.mxu1 %v1771_v27  ;;  %295 = vmatpush.msra.mxu2 %v1894_v22 }
  0x33   :  { %155 = vmatpush.msra.mxu0 %v122_v28  ;;  %v1904_v28 = vld [vmem:[#allocation8 + $0xb0] sm:$0xff]  ;;  %315 = vmatpush.msra.mxu3 %v1896_v24 }
  0x34   :  { %212 = vmatpush.msra.mxu1 %v1774_v29  ;;  %296 = vmatpush.msra.mxu2 %v1902_v26 }
  0x35   :  { %156 = vmatpush.msra.mxu0 %v121_v30  ;;  %v1910_v30 = vld [vmem:[#allocation8 + $0x28] sm:$0xff]  ;;  %316 = vmatpush.msra.mxu3 %v1904_v28 }
  0x36   :  { %213 = vmatpush.msra.mxu1 %v1777_v31  ;;  %157 = vmatmul.f32.vlgmr.msra.gmra.mxu0 %v113_v32  ;;  %v1912_v32 = vld [vmem:[#allocation8 + $0xa8] sm:$0xff] }
  0x37   :  { %214 = vmatmul.f32.vlgmr.msra.gmra.mxu1 %v1669_v33  ;;  %484 = vmatpush.msrb.mxu0 %v1733_v2 }
  0x38   :  { %359 = vmatpush.msrb.mxu1 %v1733_v2  ;;  %297 = vmatpush.msra.mxu2 %v1910_v30 }
  0x39   :  { %485 = vmatpush.msrb.mxu0 %v1736_v3  ;;  %317 = vmatpush.msra.mxu3 %v1912_v32 }
  0x3a   :  { %360 = vmatpush.msrb.mxu1 %v1736_v3 }
  0x3b   :  { %486 = vmatpush.msrb.mxu0 %v1738_v5 }
  0x3c   :  { %361 = vmatpush.msrb.mxu1 %v1738_v5 }
  0x3d   :  { %487 = vmatpush.msrb.mxu0 %v1741_v7 }
  0x3e   :  { %362 = vmatpush.msrb.mxu1 %v1741_v7 }
  0x3f   :  { %488 = vmatpush.msrb.mxu0 %v1744_v9 }
  0x40   :  { %363 = vmatpush.msrb.mxu1 %v1744_v9 }
  0x41   :  { %489 = vmatpush.msrb.mxu0 %v1747_v11 }
  0x42   :  { %364 = vmatpush.msrb.mxu1 %v1747_v11 }
  0x43   :  { %490 = vmatpush.msrb.mxu0 %v1750_v13 }
  0x44   :  { %365 = vmatpush.msrb.mxu1 %v1750_v13 }
  0x45   :  { %491 = vmatpush.msrb.mxu0 %v1753_v15 }
  0x46   :  { %366 = vmatpush.msrb.mxu1 %v1753_v15 }
  0x47   :  { %492 = vmatpush.msrb.mxu0 %v1756_v17 }
  0x48   :  { %367 = vmatpush.msrb.mxu1 %v1756_v17 }
  0x49   :  { %493 = vmatpush.msrb.mxu0 %v1759_v19 }
  0x4a   :  { %368 = vmatpush.msrb.mxu1 %v1759_v19 }
  0x4b   :  { %494 = vmatpush.msrb.mxu0 %v1762_v21 }
  0x4c   :  { %369 = vmatpush.msrb.mxu1 %v1762_v21 }
  0x4d   :  { %495 = vmatpush.msrb.mxu0 %v1765_v23 }
  0x4e   :  { %370 = vmatpush.msrb.mxu1 %v1765_v23 }
  0x4f   :  { %496 = vmatpush.msrb.mxu0 %v1768_v25 }
  0x50   :  { %371 = vmatpush.msrb.mxu1 %v1768_v25 }
  0x51   :  { %497 = vmatpush.msrb.mxu0 %v1771_v27 }
  0x52   :  { %372 = vmatpush.msrb.mxu1 %v1771_v27 }
  0x53   :  { %498 = vmatpush.msrb.mxu0 %v1774_v29 }
  0x54   :  { %373 = vmatpush.msrb.mxu1 %v1774_v29 }
  0x55   :  { %499 = vmatpush.msrb.mxu0 %v1777_v31 }
  0x56   :  { %374 = vmatpush.msrb.mxu1 %v1777_v31 }
  0x57   :  { %662 = vmatpush.msra.mxu0 %v1836_v59 }
  0x58   :  { %537 = vmatpush.msra.mxu1 %v1836_v59 }
  0x59   :  { %663 = vmatpush.msra.mxu0 %v1838_v60 }
  0x5a   :  { %538 = vmatpush.msra.mxu1 %v1838_v60 }
  0x5b   :  { %664 = vmatpush.msra.mxu0 %v1846_v63 }
  0x5c   :  { %539 = vmatpush.msra.mxu1 %v1846_v63 }
  0x5d   :  { %665 = vmatpush.msra.mxu0 %v1854_v1 }
  0x5e   :  { %540 = vmatpush.msra.mxu1 %v1854_v1 }
  0x5f   :  { %666 = vmatpush.msra.mxu0 %v1862_v6 }
  0x60   :  { %541 = vmatpush.msra.mxu1 %v1862_v6 }
  0x61   :  { %667 = vmatpush.msra.mxu0 %v1870_v10 }
  0x62   :  { %542 = vmatpush.msra.mxu1 %v1870_v10 }
  0x63   :  { %668 = vmatpush.msra.mxu0 %v1878_v14 }
  0x64   :  { %543 = vmatpush.msra.mxu1 %v1878_v14 }
  0x65   :  { %669 = vmatpush.msra.mxu0 %v1886_v18 }
  0x66   :  { %544 = vmatpush.msra.mxu1 %v1886_v18 }
  0x67   :  { %670 = vmatpush.msra.mxu0 %v1894_v22 }
  0x68   :  { %545 = vmatpush.msra.mxu1 %v1894_v22 }
  0x69   :  { %671 = vmatpush.msra.mxu0 %v1902_v26 }
  0x6a   :  { %546 = vmatpush.msra.mxu1 %v1902_v26 }
  0x6b   :  { %672 = vmatpush.msra.mxu0 %v1910_v30 }
  0x6c   :  { %547 = vmatpush.msra.mxu1 %v1910_v30 }
  0xb3   :  { %v158_v35 = vpop.f32.mrf.mxu0 }
  0xb4   :  { %v215_v36 = vpop.f32.mrf.mxu1  ;;  %v159_v37 = vadd.f32 %v1817_v34, %v158_v35  ;;  %v1918_v35 = vld [vmem:[#allocation8 + $0x20] sm:$0xff] }
  0xb5   :  { %298 = vmatpush.msra.mxu2 %v1918_v35  ;;  %548 = vmatpush.msra.mxu1 %v1918_v35 }
  0xb6   :  { %v218_v38 = vadd.f32 %v215_v36, %v159_v37  ;;  %v1920_v36 = vld [vmem:[#allocation8 + $0xa0] sm:$0xff]  ;;  %673 = vmatpush.msra.mxu0 %v1918_v35 }
  0xb7   :  { %318 = vmatpush.msra.mxu3 %v1920_v36 }
  0xb8   :  { %v1300_v39 = vmul.f32 -1.442695, %v218_v38 }
  0xba   :  { %1330 = vpow2.f32 %v1300_v39  ;;  %v1927_v39 = vld [vmem:[#allocation8 + $0x18] sm:$0xff] }
  0xbb   :  { %299 = vmatpush.msra.mxu2 %v1927_v39  ;;  %549 = vmatpush.msra.mxu1 %v1927_v39 }
  0xbc   :  { %674 = vmatpush.msra.mxu0 %v1927_v39 }
  0xbd   :  { %300 = vmatpush.msra.mxu2 %v1937_v42  ;;  %550 = vmatpush.msra.mxu1 %v1937_v42 }
  0xbe   :  { %675 = vmatpush.msra.mxu0 %v1937_v42 }
  0xc0   :  { %v1331_v40 = vpop.eup %1330 }
  0xc1   :  { %v223_v41 = vadd.f32 1.0, %v1331_v40  ;;  %v1929_v40 = vld [vmem:[#allocation8 + $0x98] sm:$0xff] }
  0xc2   :  { %319 = vmatpush.msra.mxu3 %v1929_v40 }
  0xc3   :  { %1332 = vrcp.f32 %v223_v41  ;;  %v235_v47 = vand.u32 2147483648, %v223_v41  ;;  %v233_v49 = vand.u32 2147483647, %v223_v41  ;;  %vm229_vm4 = vweird.f32 %v223_v41 }
  0xc4   :  { %1334 = vtanh.f32 %v218_v38 }
  0xc5   :  { %v236_v52 = vor.u32 1.1754944e-38, %v235_v47  ;;  %vm234_vm6 = vcmp.eq.f32.partialorder %v233_v49, 8.507059e+37  ;;  %v114_v47 = vld [vmem:[#allocation2 + $0x8] sm:$0xff] }
  0xc6   :  { %160 = vmatmul.f32.gmra.mxu0 %v114_v47  ;;  %v1960_v49 = vld [vmem:[#allocation8 + $0x88] sm:$0xff] }
  0xc7   :  { %2524 = vst [vmem:[#allocation21_spill] sm:$0xff] %v1960_v49 }
  0xc9   :  { %v1333_v43 = vpop.eup %1332 }
  0xca   :  { %v225_v45 = vmul.f32 %v1333_v43, %v223_v41  ;;  %vm230_vm2 = vweird.f32 %v1333_v43  ;;  %v1335_v54 = vpop.eup %1334 }
  0xcb   :  { %vm231_vm5 = vmor %vm229_vm4, %vm230_vm2 }
  0xcc   :  { %v226_v46 = vsub.f32 1.0, %v225_v45  ;;  %v1946_v45 = vld [vmem:[#allocation8 + $0x8] sm:$0xff] }
  0xcd   :  { %301 = vmatpush.msra.mxu2 %v1946_v45  ;;  %551 = vmatpush.msra.mxu1 %v1946_v45 }
  0xce   :  { %v227_v48 = vmul.f32 %v1333_v43, %v226_v46  ;;  %676 = vmatpush.msra.mxu0 %v1946_v45 }
  0xd0   :  { %v228_v51 = vadd.f32 %v1333_v43, %v227_v48  ;;  %v1958_v48 = vld [vmem:[#allocation8] sm:$0xff] }
  0xd1   :  { %302 = vmatpush.msra.mxu2 %v1958_v48  ;;  %552 = vmatpush.msra.mxu1 %v1958_v48 }
  0xd2   :  { %v232_v53 = vsel %vm231_vm5, %v1333_v43, %v228_v51  ;;  %v1939_v43 = vld [vmem:[#allocation8 + $0x90] sm:$0xff]  ;;  %v1964_v51 = vld [vmem:[#allocation8 + $0x80] sm:$0xff]  ;;  %677 = vmatpush.msra.mxu0 %v1958_v48 }
  0xd3   :  { %v237_v55 = vsel %vm234_vm6, %v236_v52, %v232_v53  ;;  %2523 = vst [vmem:[#allocation20_spill] sm:$0xff] %v1939_v43  ;;  %320 = vmatpush.msra.mxu3 %v1939_v43  ;;  %412 = vmatpush.msrb.mxu2 %v1836_v59 }
  0xd4   :  { %v1830_v56 = vsel %vm1824_vm3, %v1335_v54, %v237_v55  ;;  %2525 = vst [vmem:[#allocation22_spill] sm:$0xff] %v1964_v51 }
  0xd5   :  { %240 = vrot.lane.b32.xlu0 %v1830_v56, %s1670_s29  ;;  %v245_v37 = vmul.f32 0.0, %v1830_v56  ;;  %321 = vmatpush.msra.mxu3 %v1960_v49 }
  0xd6   :  { %413 = vmatpush.msrb.mxu2 %v1838_v60 }
  0xd7   :  { %322 = vmatpush.msra.mxu3 %v1964_v51 }
  0xd8   :  { %323 = vmatmul.f32.vlgmr.msra.gmra.mxu3 %v1669_v33  ;;  %414 = vmatpush.msrb.mxu2 %v1846_v63 }
  0xd9   :  { %432 = vmatpush.msrb.mxu3 %v1840_v61 }
  0xda   :  { %415 = vmatpush.msrb.mxu2 %v1854_v1 }
  0xdb   :  { %433 = vmatpush.msrb.mxu3 %v1844_v62 }
  0xdc   :  { %416 = vmatpush.msrb.mxu2 %v1862_v6 }
  0xdd   :  { %434 = vmatpush.msrb.mxu3 %v1848_v0 }
  0xde   :  { %417 = vmatpush.msrb.mxu2 %v1870_v10 }
  0xdf   :  { %435 = vmatpush.msrb.mxu3 %v1856_v4 }
  0xe0   :  { %418 = vmatpush.msrb.mxu2 %v1878_v14 }
  0xe1   :  { %436 = vmatpush.msrb.mxu3 %v1864_v8 }
  0xe2   :  { %419 = vmatpush.msrb.mxu2 %v1886_v18 }
  0xe3   :  { %437 = vmatpush.msrb.mxu3 %v1872_v12 }
  0xe4   :  { %420 = vmatpush.msrb.mxu2 %v1894_v22 }
  0xe5   :  { %438 = vmatpush.msrb.mxu3 %v1880_v16 }
  0xe6   :  { %421 = vmatpush.msrb.mxu2 %v1902_v26 }
  0xe7   :  { %439 = vmatpush.msrb.mxu3 %v1888_v20 }
  0xe8   :  { %422 = vmatpush.msrb.mxu2 %v1910_v30 }
  0xe9   :  { %440 = vmatpush.msrb.mxu3 %v1896_v24 }
  0xea   :  { %423 = vmatpush.msrb.mxu2 %v1918_v35 }
  0xeb   :  { %441 = vmatpush.msrb.mxu3 %v1904_v28 }
  0xec   :  { %424 = vmatpush.msrb.mxu2 %v1927_v39 }
  0xed   :  { %442 = vmatpush.msrb.mxu3 %v1912_v32 }
  0xee   :  { %425 = vmatpush.msrb.mxu2 %v1937_v42 }
  0xef   :  { %443 = vmatpush.msrb.mxu3 %v1920_v36 }
  0xf0   :  { %426 = vmatpush.msrb.mxu2 %v1946_v45 }
  0xf1   :  { %444 = vmatpush.msrb.mxu3 %v1929_v40 }
  0xf2   :  { %427 = vmatpush.msrb.mxu2 %v1958_v48 }
  0xf3   :  { %445 = vmatpush.msrb.mxu3 %v1939_v43 }
  0xf5   :  { %446 = vmatpush.msrb.mxu3 %v1960_v49 }
  0xf7   :  { %447 = vmatpush.msrb.mxu3 %v1964_v51 }
  0xf9   :  { %609 = vmatpush.msra.mxu3 %v1733_v2 }
  0xfb   :  { %610 = vmatpush.msra.mxu3 %v1736_v3 }
  0xfd   :  { %611 = vmatpush.msra.mxu3 %v1738_v5 }
  0xff   :  { %612 = vmatpush.msra.mxu3 %v1741_v7 }
 0x101   :  { %613 = vmatpush.msra.mxu3 %v1744_v9 }
 0x103   :  { %614 = vmatpush.msra.mxu3 %v1747_v11 }
 0x105   :  { %615 = vmatpush.msra.mxu3 %v1750_v13 }
 0x107   :  { %616 = vmatpush.msra.mxu3 %v1753_v15 }
 0x109   :  { %617 = vmatpush.msra.mxu3 %v1756_v17 }
 0x10b   :  { %618 = vmatpush.msra.mxu3 %v1759_v19 }
 0x10d   :  { %619 = vmatpush.msra.mxu3 %v1762_v21 }
 0x10f   :  { %620 = vmatpush.msra.mxu3 %v1765_v23 }
 0x111   :  { %621 = vmatpush.msra.mxu3 %v1768_v25 }
 0x113   :  { %622 = vmatpush.msra.mxu3 %v1771_v27 }
 0x115   :  { %623 = vmatpush.msra.mxu3 %v1774_v29 }
 0x117   :  { %624 = vmatpush.msra.mxu3 %v1777_v31 }
 0x143   :  { %v161_v53 = vpop.f32.mrf.mxu0 }
 0x144   :  { %v162_v54 = vadd.f32 %v1817_v34, %v161_v53 }
 0x147   :  { %v241_v57 = vpop.permute.xlu0 %240 }
 0x148   :  { %v242_v58 = vmul.f32 %v241_v57, %v1830_v56 }
 0x14a   :  { %243 = vrot.lane.b32.xlu0 %v242_v58, %s1671_s30  ;;  %v2055_v58 = vld [vmem:[%s2497_s5] ss:$0 sm:$0xff] }
 0x14b   :  { %2526 = vst [vmem:[#allocation23_spill] sm:$0xff] %v2055_v58 }
 0x1bc   :  { %v244_v38 = vpop.permute.xlu0 %243 }
 0x1bd   :  { %v1933_v41 = vadd.f32 %v245_v37, %v244_v38  ;;  %v324_v38 = vpop.f32.mrf.mxu3 }
 0x1bf   :  { %1336 = vtanh.f32 %v1933_v41 }
 0x1c5   :  { %v1337_v46 = vpop.eup %1336 }
 0x1c6   :  { %248 = vrot.lane.b32.xlu1 %v1337_v46, %s1670_s29 }
 0x238   :  { %v249_v33 = vpop.permute.xlu1 %248 }
 0x239   :  { %v250_v52 = vmul.f32 %v249_v33, %v1830_v56 }
 0x23b   :  { %303 = vmatmul.f32.vlgmr.msra.gmra.mxu2 %v250_v52  ;;  %375 = vmatmul.f32.vlgmr.msrb.gmra.mxu1 %v250_v52 }
 0x23c   :  { %557 = vmatpush.msra.mxu2 %v1840_v61  ;;  %682 = vmatpush.msrb.mxu1 %v1840_v61 }
 0x23e   :  { %558 = vmatpush.msra.mxu2 %v1844_v62  ;;  %683 = vmatpush.msrb.mxu1 %v1844_v62 }
 0x240   :  { %559 = vmatpush.msra.mxu2 %v1848_v0  ;;  %684 = vmatpush.msrb.mxu1 %v1848_v0 }
 0x242   :  { %560 = vmatpush.msra.mxu2 %v1856_v4  ;;  %685 = vmatpush.msrb.mxu1 %v1856_v4 }
 0x244   :  { %561 = vmatpush.msra.mxu2 %v1864_v8  ;;  %686 = vmatpush.msrb.mxu1 %v1864_v8 }
 0x246   :  { %562 = vmatpush.msra.mxu2 %v1872_v12  ;;  %687 = vmatpush.msrb.mxu1 %v1872_v12 }
 0x248   :  { %563 = vmatpush.msra.mxu2 %v1880_v16  ;;  %688 = vmatpush.msrb.mxu1 %v1880_v16 }
 0x24a   :  { %564 = vmatpush.msra.mxu2 %v1888_v20  ;;  %689 = vmatpush.msrb.mxu1 %v1888_v20 }
 0x24c   :  { %565 = vmatpush.msra.mxu2 %v1896_v24  ;;  %690 = vmatpush.msrb.mxu1 %v1896_v24 }
 0x24e   :  { %566 = vmatpush.msra.mxu2 %v1904_v28  ;;  %691 = vmatpush.msrb.mxu1 %v1904_v28 }
 0x250   :  { %567 = vmatpush.msra.mxu2 %v1912_v32  ;;  %692 = vmatpush.msrb.mxu1 %v1912_v32 }
 0x252   :  { %568 = vmatpush.msra.mxu2 %v1920_v36  ;;  %693 = vmatpush.msrb.mxu1 %v1920_v36 }
 0x254   :  { %569 = vmatpush.msra.mxu2 %v1929_v40  ;;  %694 = vmatpush.msrb.mxu1 %v1929_v40 }
 0x256   :  { %570 = vmatpush.msra.mxu2 %v1939_v43  ;;  %695 = vmatpush.msrb.mxu1 %v1939_v43 }
 0x258   :  { %571 = vmatpush.msra.mxu2 %v1960_v49  ;;  %696 = vmatpush.msrb.mxu1 %v1960_v49 }
 0x25a   :  { %572 = vmatpush.msra.mxu2 %v1964_v51  ;;  %697 = vmatpush.msrb.mxu1 %v1964_v51 }
 0x2b8   :  { %v376_v55 = vpop.f32.mrf.mxu1 }
 0x2b9   :  { %v379_v56 = vadd.f32 %v376_v55, %v162_v54 }
 0x2bb   :  { %v1302_v57 = vmul.f32 -1.442695, %v379_v56 }
 0x2bd   :  { %1338 = vpow2.f32 %v1302_v57 }
 0x2be   :  { %v304_v37 = vpop.f32.mrf.mxu2 }
 0x2bf   :  { %v305_v46 = vadd.f32 %v2055_v58, %v304_v37 }
 0x2c1   :  { %v325_v47 = vadd.f32 %v324_v38, %v305_v46 }
 0x2c3   :  { %v1339_v33 = vpop.eup %1338  ;;  %v1301_v52 = vmul.f32 -1.442695, %v325_v47 }
 0x2c4   :  { %v384_v44 = vadd.f32 1.0, %v1339_v33 }
 0x2c5   :  { %1340 = vpow2.f32 %v1301_v52 }
 0x2c6   :  { %1342 = vrcp.f32 %v384_v44  ;;  %v396_v31 = vand.u32 2147483648, %v384_v44  ;;  %v394_v57 = vand.u32 2147483647, %v384_v44  ;;  %vm390_vm8 = vweird.f32 %v384_v44 }
 0x2c8   :  { %v397_v38 = vor.u32 1.1754944e-38, %v396_v31  ;;  %vm395_vm10 = vcmp.eq.f32.partialorder %v394_v57, 8.507059e+37 }
 0x2cb   :  { %v1341_v53 = vpop.eup %1340 }
 0x2cc   :  { %v1343_v34 = vpop.eup %1342  ;;  %v331_v54 = vadd.f32 1.0, %v1341_v53 }
 0x2cd   :  { %v386_v55 = vmul.f32 %v1343_v34, %v384_v44  ;;  %vm391_vm7 = vweird.f32 %v1343_v34 }
 0x2ce   :  { %1344 = vrcp.f32 %v331_v54  ;;  %vm392_vm9 = vmor %vm390_vm8, %vm391_vm7  ;;  %vm337_vm12 = vweird.f32 %v331_v54 }
 0x2cf   :  { %v387_v51 = vsub.f32 1.0, %v386_v55  ;;  %1346 = vtanh.f32 %v379_v56 }
 0x2d0   :  { %1348 = vtanh.f32 %v325_v47 }
 0x2d1   :  { %v388_v49 = vmul.f32 %v1343_v34, %v387_v51  ;;  %v343_v51 = vand.u32 2147483648, %v331_v54 }
 0x2d3   :  { %v389_v29 = vadd.f32 %v1343_v34, %v388_v49  ;;  %v341_v49 = vand.u32 2147483647, %v331_v54  ;;  %v344_v31 = vor.u32 1.1754944e-38, %v343_v51 }
 0x2d4   :  { %v1345_v37 = vpop.eup %1344 }
 0x2d5   :  { %v393_v46 = vsel %vm392_vm9, %v1343_v34, %v389_v29  ;;  %v333_v33 = vmul.f32 %v1345_v37, %v331_v54  ;;  %v1347_v52 = vpop.eup %1346  ;;  %vm338_vm11 = vweird.f32 %v1345_v37  ;;  %vm342_vm14 = vcmp.eq.f32.partialorder %v341_v49, 8.507059e+37  ;;  %v115_v54 = vld [vmem:[#allocation2 + $0x10] sm:$0xff] }
 0x2d6   :  { %v398_v58 = vsel %vm395_vm10, %v397_v38, %v393_v46  ;;  %vm339_vm13 = vmor %vm337_vm12, %vm338_vm11  ;;  %v1349_v34 = vpop.eup %1348  ;;  %163 = vmatmul.f32.gmra.mxu0 %v115_v54  ;;  %v116_v46 = vld [vmem:[#allocation2 + $0x18] sm:$0xff] }
 0x2d7   :  { %v400_v53 = vsel %vm1824_vm3, %v1347_v52, %v398_v58  ;;  %v334_v43 = vsub.f32 1.0, %v333_v33  ;;  %v117_v52 = vld [vmem:[#allocation2 + $0x20] sm:$0xff] }
 0x2d8   :  { %401 = vrot.lane.b32.xlu1 %v400_v53, %s1670_s29 }
 0x2d9   :  { %v335_v56 = vmul.f32 %v1345_v37, %v334_v43 }
 0x2db   :  { %v336_v44 = vadd.f32 %v1345_v37, %v335_v56 }
 0x2dd   :  { %v340_v29 = vsel %vm339_vm13, %v1345_v37, %v336_v44  ;;  %v406_v37 = vmul.f32 %v400_v53, %v1933_v41  ;;  %v118_v44 = vld [vmem:[#allocation2 + $0x28] sm:$0xff]  ;;  %v119_v41 = vld [vmem:[#allocation2 + $0x30] sm:$0xff] }
 0x2de   :  { %v345_v55 = vsel %vm342_vm14, %v344_v31, %v340_v29  ;;  %166 = vmatmul.f32.gmra.mxu0 %v116_v46  ;;  %v2535_v46 = vld [vmem:[#allocation23_spill] sm:$0xff] }
 0x2df   :  { %v347_v57 = vsel %vm1824_vm3, %v1349_v34, %v345_v55  ;;  %v120_v55 = vld [vmem:[#allocation2 + $0x38] sm:$0xff] }
 0x2e0   :  { %348 = vrot.lane.b32.xlu2 %v347_v57, %s1670_s29  ;;  %v353_v56 = vmul.f32 0.0, %v347_v57 }
 0x2e6   :  { %169 = vmatmul.f32.gmra.mxu0 %v117_v52 }
 0x2ee   :  { %172 = vmatmul.f32.gmra.mxu0 %v118_v44 }
 0x2f6   :  { %175 = vmatmul.f32.gmra.mxu0 %v119_v41 }
 0x2fe   :  { %178 = vmatmul.f32.gmra.mxu0 %v120_v55 }
 0x33a   :  { %v349_v58 = vpop.permute.xlu2 %348 }
 0x33b   :  { %v350_v47 = vmul.f32 %v349_v58, %v347_v57 }
 0x33d   :  { %351 = vrot.lane.b32.xlu0 %v350_v47, %s1671_s30 }
 0x34a   :  { %v402_v43 = vpop.permute.xlu1 %401 }
 0x34b   :  { %v403_v38 = vmul.f32 %v402_v43, %v400_v53 }
 0x34d   :  { %404 = vrot.lane.b32.xlu2 %v403_v38, %s1671_s30 }
 0x3a7   :  { %v405_v33 = vpop.permute.xlu2 %404 }
 0x3a8   :  { %v2067_v51 = vadd.f32 %v406_v37, %v405_v33 }
 0x3aa   :  { %1350 = vtanh.f32 %v2067_v51 }
 0x3af   :  { %v352_v49 = vpop.permute.xlu0 %351 }
 0x3b0   :  { %v1351_v31 = vpop.eup %1350  ;;  %v2070_v29 = vadd.f32 %v353_v56, %v352_v49 }
 0x3b1   :  { %409 = vrot.lane.b32.xlu1 %v1351_v31, %s1670_s29 }
 0x3b2   :  { %1352 = vtanh.f32 %v2070_v29 }
 0x3b8   :  { %v1353_v34 = vpop.eup %1352 }
 0x3b9   :  { %356 = vrot.lane.b32.xlu2 %v1353_v34, %s1670_s29 }
 0x413   :  { %v357_v58 = vpop.permute.xlu2 %356 }
 0x414   :  { %v358_v47 = vmul.f32 %v357_v58, %v347_v57 }
 0x416   :  { %448 = vmatmul.f32.vlgmr.msrb.gmra.mxu3 %v358_v47 }
 0x417   :  { %787 = vmatpush.msrb.mxu3 %v1836_v59 }
 0x419   :  { %788 = vmatpush.msrb.mxu3 %v1838_v60 }
 0x41b   :  { %789 = vmatpush.msrb.mxu3 %v1846_v63 }
 0x41d   :  { %790 = vmatpush.msrb.mxu3 %v1854_v1 }
 0x41f   :  { %791 = vmatpush.msrb.mxu3 %v1862_v6 }
 0x421   :  { %792 = vmatpush.msrb.mxu3 %v1870_v10 }
 0x423   :  { %v410_v43 = vpop.permute.xlu1 %409  ;;  %793 = vmatpush.msrb.mxu3 %v1878_v14 }
 0x424   :  { %v411_v38 = vmul.f32 %v410_v43, %v400_v53 }
 0x425   :  { %794 = vmatpush.msrb.mxu3 %v1886_v18 }
 0x426   :  { %428 = vmatmul.f32.vlgmr.msrb.gmra.mxu2 %v411_v38  ;;  %500 = vmatmul.f32.vlgmr.msrb.gmra.mxu0 %v411_v38 }
 0x427   :  { %734 = vmatpush.msrb.mxu2 %v1733_v2  ;;  %807 = vmatpush.msrb.mxu0 %v1840_v61  ;;  %v2527_v2 = vld [vmem:[#allocation20_spill] sm:$0xff] }
 0x428   :  { %795 = vmatpush.msrb.mxu3 %v1894_v22 }
 0x429   :  { %735 = vmatpush.msrb.mxu2 %v1736_v3  ;;  %808 = vmatpush.msrb.mxu0 %v1844_v62  ;;  %v2528_v3 = vld [vmem:[#allocation16_spill] sm:$0xff] }
 0x42a   :  { %796 = vmatpush.msrb.mxu3 %v1902_v26 }
 0x42b   :  { %736 = vmatpush.msrb.mxu2 %v1738_v5  ;;  %809 = vmatpush.msrb.mxu0 %v1848_v0  ;;  %v2529_v5 = vld [vmem:[#allocation21_spill] sm:$0xff] }
 0x42c   :  { %797 = vmatpush.msrb.mxu3 %v1910_v30 }
 0x42d   :  { %737 = vmatpush.msrb.mxu2 %v1741_v7  ;;  %810 = vmatpush.msrb.mxu0 %v1856_v4  ;;  %v2530_v7 = vld [vmem:[#allocation17_spill] sm:$0xff] }
 0x42e   :  { %798 = vmatpush.msrb.mxu3 %v1918_v35 }
 0x42f   :  { %738 = vmatpush.msrb.mxu2 %v1744_v9  ;;  %811 = vmatpush.msrb.mxu0 %v1864_v8  ;;  %v2531_v9 = vld [vmem:[#allocation22_spill] sm:$0xff] }
 0x430   :  { %799 = vmatpush.msrb.mxu3 %v1927_v39 }
 0x431   :  { %739 = vmatpush.msrb.mxu2 %v1747_v11  ;;  %812 = vmatpush.msrb.mxu0 %v1872_v12  ;;  %v164_v11 = vpop.f32.mrf.mxu0 }
 0x432   :  { %800 = vmatpush.msrb.mxu3 %v1937_v42 }
 0x433   :  { %740 = vmatpush.msrb.mxu2 %v1750_v13  ;;  %813 = vmatpush.msrb.mxu0 %v1880_v16 }
 0x434   :  { %801 = vmatpush.msrb.mxu3 %v1946_v45 }
 0x435   :  { %741 = vmatpush.msrb.mxu2 %v1753_v15  ;;  %814 = vmatpush.msrb.mxu0 %v1888_v20 }
 0x436   :  { %802 = vmatpush.msrb.mxu3 %v1958_v48 }
 0x437   :  { %742 = vmatpush.msrb.mxu2 %v1756_v17  ;;  %815 = vmatpush.msrb.mxu0 %v1896_v24 }
 0x439   :  { %743 = vmatpush.msrb.mxu2 %v1759_v19  ;;  %816 = vmatpush.msrb.mxu0 %v1904_v28  ;;  %v2123_v13 = vpop.f32.mrf.mxu0 }
 0x43b   :  { %744 = vmatpush.msrb.mxu2 %v1762_v21  ;;  %817 = vmatpush.msrb.mxu0 %v1912_v32 }
 0x43d   :  { %745 = vmatpush.msrb.mxu2 %v1765_v23  ;;  %818 = vmatpush.msrb.mxu0 %v1920_v36  ;;  %v2534_v23 = vld [vmem:[#allocation18_spill] sm:$0xff] }
 0x43f   :  { %746 = vmatpush.msrb.mxu2 %v1768_v25  ;;  %819 = vmatpush.msrb.mxu0 %v1929_v40  ;;  %v165_v25 = vadd.f32 %v2534_v23, %v164_v11 }
 0x441   :  { %747 = vmatpush.msrb.mxu2 %v1771_v27  ;;  %820 = vmatpush.msrb.mxu0 %v2527_v2  ;;  %v2125_v15 = vpop.f32.mrf.mxu0 }
 0x443   :  { %748 = vmatpush.msrb.mxu2 %v2528_v3  ;;  %821 = vmatpush.msrb.mxu0 %v2529_v5 }
 0x445   :  { %749 = vmatpush.msrb.mxu2 %v2530_v7  ;;  %822 = vmatpush.msrb.mxu0 %v2531_v9 }
 0x449   :  { %v2127_v17 = vpop.f32.mrf.mxu0 }
 0x451   :  { %v2129_v19 = vpop.f32.mrf.mxu0 }
 0x452   :  { %2532 = vst [vmem:[#allocation20_spill] sm:$0xff] %v2129_v19 }
 0x459   :  { %v2131_v21 = vpop.f32.mrf.mxu0 }
 0x45a   :  { %2533 = vst [vmem:[#allocation16_spill] sm:$0xff] %v2131_v21 }
 0x499   :  { %v449_v33 = vpop.f32.mrf.mxu3 }
 0x4a3   :  { %v501_v27 = vpop.f32.mrf.mxu0 }
 0x4a4   :  { %v504_v53 = vadd.f32 %v501_v27, %v165_v25 }
 0x4a6   :  { %v1304_v57 = vmul.f32 -1.442695, %v504_v53 }
 0x4a8   :  { %1354 = vpow2.f32 %v1304_v57 }
 0x4a9   :  { %v429_v54 = vpop.f32.mrf.mxu2 }
 0x4aa   :  { %v430_v37 = vadd.f32 %v2535_v46, %v429_v54 }
 0x4ac   :  { %v450_v52 = vadd.f32 %v449_v33, %v430_v37 }
 0x4ae   :  { %v1355_v56 = vpop.eup %1354  ;;  %v1303_v49 = vmul.f32 -1.442695, %v450_v52 }
 0x4af   :  { %v509_v44 = vadd.f32 1.0, %v1355_v56 }
 0x4b0   :  { %1356 = vpow2.f32 %v1303_v49 }
 0x4b1   :  { %1358 = vrcp.f32 %v509_v44  ;;  %v521_v47 = vand.u32 2147483648, %v509_v44  ;;  %v519_v38 = vand.u32 2147483647, %v509_v44  ;;  %vm515_vm0 = vweird.f32 %v509_v44 }
 0x4b3   :  { %v522_v11 = vor.u32 1.1754944e-38, %v521_v47  ;;  %vm520_vm2 = vcmp.eq.f32.partialorder %v519_v38, 8.507059e+37 }
 0x4b6   :  { %v1357_v31 = vpop.eup %1356 }
 0x4b7   :  { %v1359_v34 = vpop.eup %1358  ;;  %v456_v41 = vadd.f32 1.0, %v1357_v31 }
 0x4b8   :  { %v511_v55 = vmul.f32 %v1359_v34, %v509_v44  ;;  %vm516_vm15 = vweird.f32 %v1359_v34 }
 0x4b9   :  { %1360 = vrcp.f32 %v456_v41  ;;  %vm517_vm1 = vmor %vm515_vm0, %vm516_vm15  ;;  %v466_v49 = vand.u32 2147483647, %v456_v41  ;;  %vm462_vm5 = vweird.f32 %v456_v41 }
 0x4ba   :  { %v512_v58 = vsub.f32 1.0, %v511_v55  ;;  %1362 = vtanh.f32 %v504_v53  ;;  %v468_v53 = vand.u32 2147483648, %v456_v41 }
 0x4bb   :  { %1364 = vtanh.f32 %v450_v52  ;;  %vm467_vm7 = vcmp.eq.f32.partialorder %v466_v49, 8.507059e+37  ;;  %v2157_v49 = vld [vmem:[#allocation7 + $0x70] sm:$0xff] }
 0x4bc   :  { %v513_v43 = vmul.f32 %v1359_v34, %v512_v58  ;;  %v469_v31 = vor.u32 1.1754944e-38, %v468_v53 }
 0x4be   :  { %v514_v3 = vadd.f32 %v1359_v34, %v513_v43 }
 0x4bf   :  { %v1361_v7 = vpop.eup %1360 }
 0x4c0   :  { %v518_v25 = vsel %vm517_vm1, %v1359_v34, %v514_v3  ;;  %v458_v27 = vmul.f32 %v1361_v7, %v456_v41  ;;  %v1363_v57 = vpop.eup %1362  ;;  %vm463_vm4 = vweird.f32 %v1361_v7 }
 0x4c1   :  { %v523_v54 = vsel %vm520_vm2, %v522_v11, %v518_v25  ;;  %vm464_vm6 = vmor %vm462_vm5, %vm463_vm4  ;;  %v1365_v55 = vpop.eup %1364 }
 0x4c2   :  { %v525_v37 = vsel %vm1824_vm3, %v1363_v57, %v523_v54  ;;  %v459_v33 = vsub.f32 1.0, %v458_v27 }
 0x4c3   :  { %526 = vrot.lane.b32.xlu0 %v525_v37, %s1670_s29  ;;  %v531_v41 = vmul.f32 %v525_v37, %v2067_v51 }
 0x4c4   :  { %v460_v56 = vmul.f32 %v1361_v7, %v459_v33 }
 0x4c6   :  { %v461_v44 = vadd.f32 %v1361_v7, %v460_v56  ;;  %v2153_v56 = vld [vmem:[#allocation7 + $0x78] sm:$0xff] }
 0x4c8   :  { %v465_v34 = vsel %vm464_vm6, %v1361_v7, %v461_v44  ;;  %v2161_v44 = vld [vmem:[#allocation7 + $0x68] sm:$0xff] }
 0x4c9   :  { %v470_v58 = vsel %vm467_vm7, %v469_v31, %v465_v34  ;;  %v2165_v31 = vld [vmem:[#allocation7 + $0x60] sm:$0xff] }
 0x4ca   :  { %v472_v47 = vsel %vm1824_vm3, %v1365_v55, %v470_v58 }
 0x4cb   :  { %473 = vrot.lane.b32.xlu1 %v472_v47, %s1670_s29  ;;  %v478_v27 = vmul.f32 %v472_v47, %v2070_v29 }
 0x535   :  { %v527_v52 = vpop.permute.xlu0 %526 }
 0x536   :  { %v528_v43 = vmul.f32 %v527_v52, %v525_v37 }
 0x538   :  { %529 = vrot.lane.b32.xlu2 %v528_v43, %s1671_s30 }
 0x53d   :  { %v474_v38 = vpop.permute.xlu1 %473 }
 0x53e   :  { %v475_v3 = vmul.f32 %v474_v38, %v472_v47 }
 0x540   :  { %476 = vrot.lane.b32.xlu0 %v475_v3, %s1671_s30 }
 0x592   :  { %v530_v11 = vpop.permute.xlu2 %529 }
 0x593   :  { %v2144_v7 = vadd.f32 %v531_v41, %v530_v11 }
 0x595   :  { %1366 = vtanh.f32 %v2144_v7 }
 0x59b   :  { %v1367_v25 = vpop.eup %1366 }
 0x59c   :  { %534 = vrot.lane.b32.xlu1 %v1367_v25, %s1670_s29 }
 0x5b2   :  { %v477_v57 = vpop.permute.xlu0 %476 }
 0x5b3   :  { %v2149_v54 = vadd.f32 %v478_v27, %v477_v57 }
 0x5b5   :  { %1368 = vtanh.f32 %v2149_v54 }
 0x5bb   :  { %v1369_v33 = vpop.eup %1368 }
 0x5bc   :  { %481 = vrot.lane.b32.xlu2 %v1369_v33, %s1670_s29 }
 0x60e   :  { %v535_v53 = vpop.permute.xlu1 %534 }
 0x60f   :  { %v536_v51 = vmul.f32 %v535_v53, %v525_v37 }
 0x611   :  { %553 = vmatmul.f32.vlgmr.msra.gmra.mxu1 %v536_v51  ;;  %625 = vmatmul.f32.vlgmr.msra.gmra.mxu3 %v536_v51 }
 0x612   :  { %859 = vmatpush.msra.mxu1 %v2153_v56  ;;  %932 = vmatpush.msra.mxu3 %v1840_v61  ;;  %v2169_v61 = vld [vmem:[#allocation7 + $0x58] sm:$0xff] }
 0x614   :  { %860 = vmatpush.msra.mxu1 %v2157_v49  ;;  %933 = vmatpush.msra.mxu3 %v1844_v62  ;;  %v2174_v62 = vld [vmem:[#allocation7 + $0x50] sm:$0xff] }
 0x616   :  { %v482_v29 = vpop.permute.xlu2 %481  ;;  %861 = vmatpush.msra.mxu1 %v2161_v44  ;;  %934 = vmatpush.msra.mxu3 %v1848_v0  ;;  %v2179_v0 = vld [vmem:[#allocation7 + $0x48] sm:$0xff] }
 0x617   :  { %v483_v37 = vmul.f32 %v482_v29, %v472_v47 }
 0x618   :  { %862 = vmatpush.msra.mxu1 %v2165_v31  ;;  %935 = vmatpush.msra.mxu3 %v1856_v4  ;;  %v2184_v4 = vld [vmem:[#allocation7 + $0x40] sm:$0xff] }
 0x619   :  { %573 = vmatmul.f32.vlgmr.msra.gmra.mxu2 %v483_v37 }
 0x61a   :  { %863 = vmatpush.msra.mxu1 %v2169_v61  ;;  %912 = vmatpush.msra.mxu2 %v1836_v59  ;;  %v2189_v59 = vld [vmem:[#allocation7 + $0x38] sm:$0xff] }
 0x61b   :  { %936 = vmatpush.msra.mxu3 %v1864_v8  ;;  %v2214_v8 = vld [vmem:[#allocation7 + $0x10] sm:$0xff] }
 0x61c   :  { %864 = vmatpush.msra.mxu1 %v2174_v62  ;;  %913 = vmatpush.msra.mxu2 %v1838_v60  ;;  %v2194_v60 = vld [vmem:[#allocation7 + $0x30] sm:$0xff] }
 0x61d   :  { %937 = vmatpush.msra.mxu3 %v1872_v12  ;;  %v2224_v12 = vld [vmem:[#allocation7] sm:$0xff] }
 0x61e   :  { %865 = vmatpush.msra.mxu1 %v2179_v0  ;;  %914 = vmatpush.msra.mxu2 %v1846_v63  ;;  %v2199_v63 = vld [vmem:[#allocation7 + $0x28] sm:$0xff] }
 0x61f   :  { %938 = vmatpush.msra.mxu3 %v1880_v16 }
 0x620   :  { %866 = vmatpush.msra.mxu1 %v2184_v4  ;;  %915 = vmatpush.msra.mxu2 %v1854_v1  ;;  %v2204_v1 = vld [vmem:[#allocation7 + $0x20] sm:$0xff] }
 0x621   :  { %939 = vmatpush.msra.mxu3 %v1888_v20 }
 0x622   :  { %867 = vmatpush.msra.mxu1 %v2189_v59  ;;  %916 = vmatpush.msra.mxu2 %v1862_v6  ;;  %v2209_v6 = vld [vmem:[#allocation7 + $0x18] sm:$0xff] }
 0x623   :  { %940 = vmatpush.msra.mxu3 %v1896_v24 }
 0x624   :  { %868 = vmatpush.msra.mxu1 %v2194_v60  ;;  %917 = vmatpush.msra.mxu2 %v1870_v10  ;;  %v2219_v10 = vld [vmem:[#allocation7 + $0x8] sm:$0xff] }
 0x625   :  { %941 = vmatpush.msra.mxu3 %v1904_v28 }
 0x626   :  { %869 = vmatpush.msra.mxu1 %v2199_v63  ;;  %918 = vmatpush.msra.mxu2 %v1878_v14  ;;  %v168_v14 = vadd.f32 %v2534_v23, %v2123_v13 }
 0x627   :  { %942 = vmatpush.msra.mxu3 %v1912_v32 }
 0x628   :  { %870 = vmatpush.msra.mxu1 %v2204_v1  ;;  %919 = vmatpush.msra.mxu2 %v1886_v18 }
 0x629   :  { %943 = vmatpush.msra.mxu3 %v1920_v36 }
 0x62a   :  { %871 = vmatpush.msra.mxu1 %v2209_v6  ;;  %920 = vmatpush.msra.mxu2 %v1894_v22 }
 0x62b   :  { %944 = vmatpush.msra.mxu3 %v1929_v40 }
 0x62c   :  { %872 = vmatpush.msra.mxu1 %v2214_v8  ;;  %921 = vmatpush.msra.mxu2 %v1902_v26 }
 0x62d   :  { %945 = vmatpush.msra.mxu3 %v2527_v2 }
 0x62e   :  { %873 = vmatpush.msra.mxu1 %v2219_v10  ;;  %922 = vmatpush.msra.mxu2 %v1910_v30 }
 0x62f   :  { %946 = vmatpush.msra.mxu3 %v2529_v5 }
 0x630   :  { %874 = vmatpush.msra.mxu1 %v2224_v12  ;;  %923 = vmatpush.msra.mxu2 %v1918_v35 }
 0x631   :  { %947 = vmatpush.msra.mxu3 %v2531_v9 }
 0x632   :  { %924 = vmatpush.msra.mxu2 %v1927_v39 }
 0x634   :  { %925 = vmatpush.msra.mxu2 %v1937_v42 }
 0x636   :  { %926 = vmatpush.msra.mxu2 %v1946_v45 }
 0x638   :  { %927 = vmatpush.msra.mxu2 %v1958_v48 }
 0x68e   :  { %v554_v22 = vpop.f32.mrf.mxu1 }
 0x68f   :  { %v555_v24 = vadd.f32 %v2535_v46, %v554_v22 }
 0x694   :  { %v626_v16 = vpop.f32.mrf.mxu3 }
 0x695   :  { %v629_v18 = vadd.f32 %v626_v16, %v168_v14 }
 0x697   :  { %v1306_v20 = vmul.f32 -1.442695, %v629_v18 }
 0x699   :  { %1370 = vpow2.f32 %v1306_v20 }
 0x69c   :  { %v574_v26 = vpop.f32.mrf.mxu2 }
 0x69d   :  { %v575_v28 = vadd.f32 %v574_v26, %v555_v24 }
 0x69f   :  { %v1371_v30 = vpop.eup %1370  ;;  %v1305_v32 = vmul.f32 -1.442695, %v575_v28 }
 0x6a0   :  { %v634_v35 = vadd.f32 1.0, %v1371_v30 }
 0x6a1   :  { %1372 = vpow2.f32 %v1305_v32 }
 0x6a2   :  { %1374 = vrcp.f32 %v634_v35  ;;  %v646_v23 = vand.u32 2147483648, %v634_v35  ;;  %v644_v52 = vand.u32 2147483647, %v634_v35  ;;  %vm640_vm9 = vweird.f32 %v634_v35 }
 0x6a4   :  { %v647_v3 = vor.u32 1.1754944e-38, %v646_v23  ;;  %vm645_vm11 = vcmp.eq.f32.partialorder %v644_v52, 8.507059e+37  ;;  %v2255_v52 = vld [vmem:[#allocation8 + $0xf8] sm:$0xff] }
 0x6a7   :  { %v1373_v39 = vpop.eup %1372 }
 0x6a8   :  { %v1375_v34 = vpop.eup %1374  ;;  %v581_v55 = vadd.f32 1.0, %v1373_v39 }
 0x6a9   :  { %v636_v58 = vmul.f32 %v1375_v34, %v634_v35  ;;  %vm641_vm8 = vweird.f32 %v1375_v34 }
 0x6aa   :  { %1376 = vrcp.f32 %v581_v55  ;;  %vm642_vm10 = vmor %vm640_vm9, %vm641_vm8  ;;  %v593_v53 = vand.u32 2147483648, %v581_v55  ;;  %v591_v29 = vand.u32 2147483647, %v581_v55  ;;  %vm587_vm13 = vweird.f32 %v581_v55 }
 0x6ab   :  { %v637_v13 = vsub.f32 1.0, %v636_v58  ;;  %1378 = vtanh.f32 %v629_v18 }
 0x6ac   :  { %1380 = vtanh.f32 %v575_v28  ;;  %v594_v14 = vor.u32 1.1754944e-38, %v593_v53  ;;  %vm592_vm15 = vcmp.eq.f32.partialorder %v591_v29, 8.507059e+37  ;;  %v2288_v53 = vld [vmem:[#allocation8 + $0xc8] sm:$0xff]  ;;  %v2295_v29 = vld [vmem:[#allocation8 + $0xc0] sm:$0xff] }
 0x6ad   :  { %v638_v47 = vmul.f32 %v1375_v34, %v637_v13 }
 0x6af   :  { %v639_v43 = vadd.f32 %v1375_v34, %v638_v47 }
 0x6b0   :  { %v1377_v38 = vpop.eup %1376 }
 0x6b1   :  { %v643_v41 = vsel %vm642_vm10, %v1375_v34, %v639_v43  ;;  %v583_v11 = vmul.f32 %v1377_v38, %v581_v55  ;;  %v1379_v25 = vpop.eup %1378  ;;  %vm588_vm12 = vweird.f32 %v1377_v38 }
 0x6b2   :  { %v648_v27 = vsel %vm645_vm11, %v647_v3, %v643_v41  ;;  %vm589_vm14 = vmor %vm587_vm13, %vm588_vm12  ;;  %v1381_v18 = vpop.eup %1380  ;;  %v2267_v41 = vld [vmem:[#allocation8 + $0xe0] sm:$0xff] }
 0x6b3   :  { %v650_v57 = vsel %vm1824_vm3, %v1379_v25, %v648_v27  ;;  %v584_v33 = vsub.f32 1.0, %v583_v11  ;;  %v2271_v11 = vld [vmem:[#allocation8 + $0x78] sm:$0xff]  ;;  %v2278_v27 = vld [vmem:[#allocation8 + $0x70] sm:$0xff] }
 0x6b4   :  { %651 = vrot.lane.b32.xlu0 %v650_v57, %s1670_s29  ;;  %v656_v32 = vmul.f32 %v650_v57, %v2144_v7  ;;  %v2274_v25 = vld [vmem:[#allocation8 + $0xd8] sm:$0xff] }
 0x6b5   :  { %v585_v51 = vmul.f32 %v1377_v38, %v584_v33  ;;  %v2285_v33 = vld [vmem:[#allocation8 + $0x68] sm:$0xff] }
 0x6b7   :  { %v586_v37 = vadd.f32 %v1377_v38, %v585_v51  ;;  %v2292_v51 = vld [vmem:[#allocation8 + $0x60] sm:$0xff] }
 0x6b9   :  { %v590_v16 = vsel %vm589_vm14, %v1377_v38, %v586_v37  ;;  %v2263_v38 = vld [vmem:[#allocation8 + $0xe8] sm:$0xff]  ;;  %v2299_v37 = vld [vmem:[#allocation8 + $0x58] sm:$0xff] }
 0x6ba   :  { %v595_v20 = vsel %vm592_vm15, %v594_v14, %v590_v16  ;;  %v2302_v14 = vld [vmem:[#allocation8 + $0xb8] sm:$0xff]  ;;  %v2306_v16 = vld [vmem:[#allocation8 + $0x50] sm:$0xff] }
 0x6bb   :  { %v597_v22 = vsel %vm1824_vm3, %v1381_v18, %v595_v20  ;;  %v2309_v18 = vld [vmem:[#allocation8 + $0xb0] sm:$0xff]  ;;  %v2313_v20 = vld [vmem:[#allocation8 + $0x48] sm:$0xff] }
 0x6bc   :  { %598 = vrot.lane.b32.xlu1 %v597_v22, %s1670_s29  ;;  %v603_v55 = vmul.f32 %v597_v22, %v2149_v54  ;;  %v2259_v54 = vld [vmem:[#allocation8 + $0xf0] sm:$0xff] }
 0x726   :  { %v652_v24 = vpop.permute.xlu0 %651 }
 0x727   :  { %v653_v26 = vmul.f32 %v652_v24, %v650_v57  ;;  %v2320_v24 = vld [vmem:[#allocation8 + $0x40] sm:$0xff] }
 0x729   :  { %654 = vrot.lane.b32.xlu2 %v653_v26, %s1671_s30  ;;  %v2325_v26 = vld [vmem:[#allocation8 + $0x38] sm:$0xff] }
 0x72e   :  { %v599_v28 = vpop.permute.xlu1 %598 }
 0x72f   :  { %v600_v30 = vmul.f32 %v599_v28, %v597_v22  ;;  %v2330_v28 = vld [vmem:[#allocation8 + $0x30] sm:$0xff] }
 0x731   :  { %601 = vrot.lane.b32.xlu0 %v600_v30, %s1671_s30  ;;  %v2335_v30 = vld [vmem:[#allocation8 + $0x28] sm:$0xff] }
 0x783   :  { %v655_v35 = vpop.permute.xlu2 %654 }
 0x784   :  { %v2245_v39 = vadd.f32 %v656_v32, %v655_v35 }
 0x786   :  { %1382 = vtanh.f32 %v2245_v39 }
 0x78c   :  { %v1383_v34 = vpop.eup %1382 }
 0x78d   :  { %659 = vrot.lane.b32.xlu1 %v1383_v34, %s1670_s29 }
 0x7a3   :  { %v602_v58 = vpop.permute.xlu0 %601 }
 0x7a4   :  { %v2250_v13 = vadd.f32 %v603_v55, %v602_v58 }
 0x7a6   :  { %1384 = vtanh.f32 %v2250_v13 }
 0x7ac   :  { %v1385_v23 = vpop.eup %1384 }
 0x7ad   :  { %606 = vrot.lane.b32.xlu2 %v1385_v23, %s1670_s29 }
 0x7ff   :  { %v660_v47 = vpop.permute.xlu1 %659 }
 0x800   :  { %v661_v7 = vmul.f32 %v660_v47, %v650_v57  ;;  %v2281_v57 = vld [vmem:[#allocation8 + $0xd0] sm:$0xff] }
 0x802   :  { %678 = vmatmul.f32.vlgmr.msra.gmra.mxu0 %v661_v7  ;;  %750 = vmatmul.f32.vlgmr.msrb.gmra.mxu2 %v661_v7 }
 0x803   :  { %984 = vmatpush.msra.mxu0 %v2153_v56  ;;  %1057 = vmatpush.msrb.mxu2 %v2255_v52 }
 0x805   :  { %985 = vmatpush.msra.mxu0 %v2157_v49  ;;  %1058 = vmatpush.msrb.mxu2 %v2259_v54 }
 0x807   :  { %v607_v43 = vpop.permute.xlu2 %606  ;;  %986 = vmatpush.msra.mxu0 %v2161_v44  ;;  %1059 = vmatpush.msrb.mxu2 %v2263_v38 }
 0x808   :  { %v608_v3 = vmul.f32 %v607_v43, %v597_v22  ;;  %v2316_v22 = vld [vmem:[#allocation8 + $0xa8] sm:$0xff] }
 0x809   :  { %987 = vmatpush.msra.mxu0 %v2165_v31  ;;  %1060 = vmatpush.msrb.mxu2 %v2267_v41 }
 0x80a   :  { %698 = vmatmul.f32.vlgmr.msrb.gmra.mxu1 %v608_v3 }
 0x80b   :  { %988 = vmatpush.msra.mxu0 %v2169_v61  ;;  %1037 = vmatpush.msrb.mxu1 %v2271_v11 }
 0x80c   :  { %1061 = vmatpush.msrb.mxu2 %v2274_v25 }
 0x80d   :  { %989 = vmatpush.msra.mxu0 %v2174_v62  ;;  %1038 = vmatpush.msrb.mxu1 %v2278_v27 }
 0x80e   :  { %1062 = vmatpush.msrb.mxu2 %v2281_v57 }
 0x80f   :  { %990 = vmatpush.msra.mxu0 %v2179_v0  ;;  %1039 = vmatpush.msrb.mxu1 %v2285_v33 }
 0x810   :  { %1063 = vmatpush.msrb.mxu2 %v2288_v53 }
 0x811   :  { %991 = vmatpush.msra.mxu0 %v2184_v4  ;;  %1040 = vmatpush.msrb.mxu1 %v2292_v51 }
 0x812   :  { %1064 = vmatpush.msrb.mxu2 %v2295_v29 }
 0x813   :  { %992 = vmatpush.msra.mxu0 %v2189_v59  ;;  %1041 = vmatpush.msrb.mxu1 %v2299_v37 }
 0x814   :  { %1065 = vmatpush.msrb.mxu2 %v2302_v14 }
 0x815   :  { %993 = vmatpush.msra.mxu0 %v2194_v60  ;;  %1042 = vmatpush.msrb.mxu1 %v2306_v16 }
 0x816   :  { %1066 = vmatpush.msrb.mxu2 %v2309_v18 }
 0x817   :  { %994 = vmatpush.msra.mxu0 %v2199_v63  ;;  %1043 = vmatpush.msrb.mxu1 %v2313_v20 }
 0x818   :  { %1067 = vmatpush.msrb.mxu2 %v2316_v22 }
 0x819   :  { %995 = vmatpush.msra.mxu0 %v2204_v1  ;;  %1044 = vmatpush.msrb.mxu1 %v2320_v24 }
 0x81a   :  { %1068 = vmatpush.msrb.mxu2 %v1920_v36  ;;  %v2340_v36 = vld [vmem:[#allocation8 + $0x20] sm:$0xff] }
 0x81b   :  { %996 = vmatpush.msra.mxu0 %v2209_v6  ;;  %1045 = vmatpush.msrb.mxu1 %v2325_v26 }
 0x81c   :  { %1069 = vmatpush.msrb.mxu2 %v1929_v40  ;;  %v2344_v40 = vld [vmem:[#allocation8 + $0x18] sm:$0xff] }
 0x81d   :  { %997 = vmatpush.msra.mxu0 %v2214_v8  ;;  %1046 = vmatpush.msrb.mxu1 %v2330_v28 }
 0x81e   :  { %1070 = vmatpush.msrb.mxu2 %v2527_v2 }
 0x81f   :  { %998 = vmatpush.msra.mxu0 %v2219_v10  ;;  %1047 = vmatpush.msrb.mxu1 %v2335_v30 }
 0x820   :  { %1071 = vmatpush.msrb.mxu2 %v2529_v5  ;;  %v2353_v5 = vld [vmem:[%s2495_s3] ss:$0 sm:$0xff] }
 0x821   :  { %999 = vmatpush.msra.mxu0 %v2224_v12  ;;  %1048 = vmatpush.msrb.mxu1 %v2340_v36  ;;  %2536 = vst [vmem:[#allocation21_spill] sm:$0xff] %v2353_v5  ;;  %v171_v32 = vadd.f32 %v2353_v5, %v2125_v15 }
 0x822   :  { %1072 = vmatpush.msrb.mxu2 %v2531_v9 }
 0x823   :  { %1049 = vmatpush.msrb.mxu1 %v2344_v40 }
 0x825   :  { %1050 = vmatpush.msrb.mxu1 %v1937_v42 }
 0x827   :  { %1051 = vmatpush.msrb.mxu1 %v1946_v45 }
 0x829   :  { %1052 = vmatpush.msrb.mxu1 %v1958_v48 }
 0x87f   :  { %v679_v2 = vpop.f32.mrf.mxu0 }
 0x880   :  { %v680_v35 = vadd.f32 %v2535_v46, %v679_v2 }
 0x885   :  { %v751_v9 = vpop.f32.mrf.mxu2 }
 0x886   :  { %v754_v34 = vadd.f32 %v751_v9, %v171_v32 }
 0x887   :  { %v699_v55 = vpop.f32.mrf.mxu1 }
 0x888   :  { %v1308_v58 = vmul.f32 -1.442695, %v754_v34  ;;  %v700_v42 = vadd.f32 %v699_v55, %v680_v35 }
 0x88a   :  { %1386 = vpow2.f32 %v1308_v58  ;;  %v1307_v45 = vmul.f32 -1.442695, %v700_v42 }
 0x88c   :  { %1388 = vpow2.f32 %v1307_v45 }
 0x890   :  { %v1387_v48 = vpop.eup %1386 }
 0x891   :  { %v759_v23 = vadd.f32 1.0, %v1387_v48 }
 0x892   :  { %v1389_v47 = vpop.eup %1388 }
 0x893   :  { %1390 = vrcp.f32 %v759_v23  ;;  %v706_v7 = vadd.f32 1.0, %v1389_v47  ;;  %v771_v46 = vand.u32 2147483648, %v759_v23  ;;  %v769_v32 = vand.u32 2147483647, %v759_v23 }
 0x894   :  { %vm765_vm1 = vweird.f32 %v759_v23 }
 0x895   :  { %1392 = vrcp.f32 %v706_v7  ;;  %v718_v35 = vand.u32 2147483648, %v706_v7  ;;  %v716_v45 = vand.u32 2147483647, %v706_v7  ;;  %v772_v48 = vor.u32 1.1754944e-38, %v771_v46 }
 0x896   :  { %1394 = vtanh.f32 %v754_v34  ;;  %vm770_vm5 = vcmp.eq.f32.partialorder %v769_v32, 8.507059e+37  ;;  %vm712_vm6 = vweird.f32 %v706_v7 }
 0x897   :  { %1396 = vtanh.f32 %v700_v42  ;;  %vm717_vm8 = vcmp.eq.f32.partialorder %v716_v45, 8.507059e+37 }
 0x899   :  { %v1391_v43 = vpop.eup %1390 }
 0x89a   :  { %v761_v3 = vmul.f32 %v1391_v43, %v759_v23  ;;  %vm766_vm0 = vweird.f32 %v1391_v43 }
 0x89b   :  { %v1393_v21 = vpop.eup %1392  ;;  %vm767_vm4 = vmor %vm765_vm1, %vm766_vm0 }
 0x89c   :  { %v762_v15 = vsub.f32 1.0, %v761_v3  ;;  %v708_v19 = vmul.f32 %v1393_v21, %v706_v7  ;;  %vm713_vm2 = vweird.f32 %v1393_v21  ;;  %v1395_v3 = vpop.eup %1394 }
 0x89d   :  { %vm714_vm7 = vmor %vm712_vm6, %vm713_vm2  ;;  %v1397_v23 = vpop.eup %1396 }
 0x89e   :  { %v763_v2 = vmul.f32 %v1391_v43, %v762_v15  ;;  %v709_v9 = vsub.f32 1.0, %v708_v19  ;;  %v719_v15 = vor.u32 1.1754944e-38, %v718_v35 }
 0x8a0   :  { %v764_v55 = vadd.f32 %v1391_v43, %v763_v2  ;;  %v710_v58 = vmul.f32 %v1393_v21, %v709_v9 }
 0x8a2   :  { %v768_v47 = vsel %vm767_vm4, %v1391_v43, %v764_v55  ;;  %v711_v5 = vadd.f32 %v1393_v21, %v710_v58 }
 0x8a3   :  { %v773_v34 = vsel %vm770_vm5, %v772_v48, %v768_v47 }
 0x8a4   :  { %v775_v19 = vsel %vm1824_vm3, %v1395_v3, %v773_v34  ;;  %v715_v42 = vsel %vm714_vm7, %v1393_v21, %v711_v5 }
 0x8a5   :  { %776 = vrot.lane.b32.xlu0 %v775_v19, %s1670_s29  ;;  %v720_v2 = vsel %vm717_vm8, %v719_v15, %v715_v42  ;;  %v781_v21 = vmul.f32 %v775_v19, %v2245_v39 }
 0x8a6   :  { %v722_v46 = vsel %vm1824_vm3, %v1397_v23, %v720_v2 }
 0x8a7   :  { %723 = vrot.lane.b32.xlu1 %v722_v46, %s1670_s29  ;;  %v728_v58 = vmul.f32 %v722_v46, %v2250_v13 }
 0x917   :  { %v777_v43 = vpop.permute.xlu0 %776 }
 0x918   :  { %v778_v7 = vmul.f32 %v777_v43, %v775_v19 }
 0x919   :  { %v724_v32 = vpop.permute.xlu1 %723 }
 0x91a   :  { %v725_v9 = vmul.f32 %v724_v32, %v722_v46  ;;  %779 = vrot.lane.b32.xlu2 %v778_v7, %s1671_s30 }
 0x91c   :  { %726 = vrot.lane.b32.xlu0 %v725_v9, %s1671_s30 }
 0x974   :  { %v780_v5 = vpop.permute.xlu2 %779 }
 0x975   :  { %v2367_v35 = vadd.f32 %v781_v21, %v780_v5 }
 0x977   :  { %1398 = vtanh.f32 %v2367_v35 }
 0x97d   :  { %v1399_v55 = vpop.eup %1398 }
 0x97e   :  { %784 = vrot.lane.b32.xlu1 %v1399_v55, %s1670_s29 }
 0x98e   :  { %v727_v45 = vpop.permute.xlu0 %726 }
 0x98f   :  { %v2372_v48 = vadd.f32 %v728_v58, %v727_v45 }
 0x991   :  { %1400 = vtanh.f32 %v2372_v48 }
 0x997   :  { %v1401_v47 = vpop.eup %1400 }
 0x998   :  { %731 = vrot.lane.b32.xlu2 %v1401_v47, %s1670_s29 }
 0x9f0   :  { %v785_v3 = vpop.permute.xlu1 %784 }
 0x9f1   :  { %v786_v39 = vmul.f32 %v785_v3, %v775_v19 }
 0x9f2   :  { %v732_v34 = vpop.permute.xlu2 %731 }
 0x9f3   :  { %v733_v15 = vmul.f32 %v732_v34, %v722_v46  ;;  %803 = vmatmul.f32.vlgmr.msrb.gmra.mxu3 %v786_v39  ;;  %875 = vmatmul.f32.vlgmr.msra.gmra.mxu1 %v786_v39 }
 0x9f4   :  { %1109 = vmatpush.msrb.mxu3 %v2153_v56  ;;  %1182 = vmatpush.msra.mxu1 %v2255_v52  ;;  %v1501_v56 = vld [vmem:[#allocation8 + $0xa0] sm:$0xff] }
 0x9f5   :  { %823 = vmatmul.f32.vlgmr.msrb.gmra.mxu0 %v733_v15 }
 0x9f6   :  { %1110 = vmatpush.msrb.mxu3 %v2157_v49  ;;  %1162 = vmatpush.msrb.mxu0 %v2271_v11  ;;  %v1502_v49 = vld [vmem:[#allocation8 + $0x98] sm:$0xff] }
 0x9f7   :  { %1183 = vmatpush.msra.mxu1 %v2259_v54 }
 0x9f8   :  { %1111 = vmatpush.msrb.mxu3 %v2161_v44  ;;  %1163 = vmatpush.msrb.mxu0 %v2278_v27  ;;  %v1503_v44 = vld [vmem:[#allocation8 + $0x90] sm:$0xff] }
 0x9f9   :  { %1184 = vmatpush.msra.mxu1 %v2263_v38 }
 0x9fa   :  { %1112 = vmatpush.msrb.mxu3 %v2165_v31  ;;  %1164 = vmatpush.msrb.mxu0 %v2285_v33  ;;  %v1504_v31 = vld [vmem:[#allocation8 + $0x10] sm:$0xff] }
 0x9fb   :  { %1185 = vmatpush.msra.mxu1 %v2267_v41 }
 0x9fc   :  { %1113 = vmatpush.msrb.mxu3 %v2169_v61  ;;  %1165 = vmatpush.msrb.mxu0 %v2292_v51  ;;  %v1505_v61 = vld [vmem:[#allocation8 + $0x88] sm:$0xff] }
 0x9fd   :  { %1186 = vmatpush.msra.mxu1 %v2274_v25 }
 0x9fe   :  { %1114 = vmatpush.msrb.mxu3 %v2174_v62  ;;  %1166 = vmatpush.msrb.mxu0 %v2299_v37  ;;  %v1506_v62 = vld [vmem:[#allocation8 + $0x8] sm:$0xff] }
 0x9ff   :  { %1187 = vmatpush.msra.mxu1 %v2281_v57 }
 0xa00   :  { %1115 = vmatpush.msrb.mxu3 %v2179_v0  ;;  %1167 = vmatpush.msrb.mxu0 %v2306_v16  ;;  %v1507_v0 = vld [vmem:[#allocation8 + $0x80] sm:$0xff] }
 0xa01   :  { %1188 = vmatpush.msra.mxu1 %v2288_v53 }
 0xa02   :  { %1116 = vmatpush.msrb.mxu3 %v2184_v4  ;;  %1168 = vmatpush.msrb.mxu0 %v2313_v20  ;;  %v1508_v4 = vld [vmem:[#allocation8] sm:$0xff] }
 0xa03   :  { %1189 = vmatpush.msra.mxu1 %v2295_v29 }
 0xa04   :  { %1117 = vmatpush.msrb.mxu3 %v2189_v59  ;;  %1169 = vmatpush.msrb.mxu0 %v2320_v24  ;;  %v2537_v59 = vld [vmem:[#allocation21_spill] sm:$0xff] }
 0xa05   :  { %1190 = vmatpush.msra.mxu1 %v2302_v14 }
 0xa06   :  { %1118 = vmatpush.msrb.mxu3 %v2194_v60  ;;  %1170 = vmatpush.msrb.mxu0 %v2325_v26  ;;  %v174_v60 = vadd.f32 %v2537_v59, %v2127_v17 }
 0xa07   :  { %1191 = vmatpush.msra.mxu1 %v2309_v18 }
 0xa08   :  { %1119 = vmatpush.msrb.mxu3 %v2199_v63  ;;  %1171 = vmatpush.msrb.mxu0 %v2330_v28 }
 0xa09   :  { %1192 = vmatpush.msra.mxu1 %v2316_v22 }
 0xa0a   :  { %1120 = vmatpush.msrb.mxu3 %v2204_v1  ;;  %1172 = vmatpush.msrb.mxu0 %v2335_v30 }
 0xa0b   :  { %1193 = vmatpush.msra.mxu1 %v1501_v56 }
 0xa0c   :  { %1121 = vmatpush.msrb.mxu3 %v2209_v6  ;;  %1173 = vmatpush.msrb.mxu0 %v2340_v36 }
 0xa0d   :  { %1194 = vmatpush.msra.mxu1 %v1502_v49  ;;  %v2538_v49 = vld [vmem:[#allocation20_spill] sm:$0xff] }
 0xa0e   :  { %1122 = vmatpush.msrb.mxu3 %v2214_v8  ;;  %1174 = vmatpush.msrb.mxu0 %v2344_v40 }
 0xa0f   :  { %1195 = vmatpush.msra.mxu1 %v1503_v44  ;;  %v177_v44 = vadd.f32 %v2537_v59, %v2538_v49 }
 0xa10   :  { %1123 = vmatpush.msrb.mxu3 %v2219_v10  ;;  %1175 = vmatpush.msrb.mxu0 %v1504_v31  ;;  %v2421_v10 = vld [vmem:[%s2497_s5] ss:$0 sm:$0xff] }
 0xa11   :  { %1196 = vmatpush.msra.mxu1 %v1505_v61 }
 0xa12   :  { %1124 = vmatpush.msrb.mxu3 %v2224_v12  ;;  %1176 = vmatpush.msrb.mxu0 %v1506_v62 }
 0xa13   :  { %1197 = vmatpush.msra.mxu1 %v1507_v0 }
 0xa14   :  { %1177 = vmatpush.msrb.mxu0 %v1508_v4 }
 0xa70   :  { %v876_v63 = vpop.f32.mrf.mxu1 }
 0xa71   :  { %v879_v1 = vadd.f32 %v876_v63, %v174_v60 }
 0xa72   :  { %v824_v13 = vpop.f32.mrf.mxu0 }
 0xa73   :  { %v1310_v6 = vmul.f32 -1.442695, %v879_v1 }
 0xa75   :  { %1402 = vpow2.f32 %v1310_v6 }
 0xa76   :  { %v804_v8 = vpop.f32.mrf.mxu3 }
 0xa77   :  { %v805_v12 = vadd.f32 %v2421_v10, %v804_v8 }
 0xa79   :  { %v825_v52 = vadd.f32 %v824_v13, %v805_v12 }
 0xa7b   :  { %v1403_v54 = vpop.eup %1402  ;;  %v1309_v38 = vmul.f32 -1.442695, %v825_v52 }
 0xa7c   :  { %v884_v41 = vadd.f32 1.0, %v1403_v54 }
 0xa7d   :  { %1404 = vpow2.f32 %v1309_v38 }
 0xa7e   :  { %1406 = vrcp.f32 %v884_v41  ;;  %v896_v33 = vand.u32 2147483648, %v884_v41  ;;  %v894_v51 = vand.u32 2147483647, %v884_v41  ;;  %vm890_vm10 = vweird.f32 %v884_v41 }
 0xa80   :  { %v897_v14 = vor.u32 1.1754944e-38, %v896_v33  ;;  %vm895_vm12 = vcmp.eq.f32.partialorder %v894_v51, 8.507059e+37 }
 0xa83   :  { %v1405_v17 = vpop.eup %1404 }
 0xa84   :  { %v1407_v11 = vpop.eup %1406  ;;  %v831_v25 = vadd.f32 1.0, %v1405_v17 }
 0xa85   :  { %v886_v27 = vmul.f32 %v1407_v11, %v884_v41  ;;  %vm891_vm9 = vweird.f32 %v1407_v11 }
 0xa86   :  { %1408 = vrcp.f32 %v831_v25  ;;  %vm892_vm11 = vmor %vm890_vm10, %vm891_vm9  ;;  %v843_v28 = vand.u32 2147483648, %v831_v25  ;;  %v841_v36 = vand.u32 2147483647, %v831_v25  ;;  %vm837_vm14 = vweird.f32 %v831_v25 }
 0xa87   :  { %v887_v57 = vsub.f32 1.0, %v886_v27  ;;  %1410 = vtanh.f32 %v879_v1 }
 0xa88   :  { %1412 = vtanh.f32 %v825_v52  ;;  %v844_v19 = vor.u32 1.1754944e-38, %v843_v28  ;;  %vm842_vm0 = vcmp.eq.f32.partialorder %v841_v36, 8.507059e+37 }
 0xa89   :  { %v888_v53 = vmul.f32 %v1407_v11, %v887_v57 }
 0xa8b   :  { %v889_v29 = vadd.f32 %v1407_v11, %v888_v53 }
 0xa8c   :  { %v1409_v37 = vpop.eup %1408 }
 0xa8d   :  { %v893_v16 = vsel %vm892_vm11, %v1407_v11, %v889_v29  ;;  %v833_v18 = vmul.f32 %v1409_v37, %v831_v25  ;;  %v1411_v20 = vpop.eup %1410  ;;  %vm838_vm13 = vweird.f32 %v1409_v37 }
 0xa8e   :  { %v898_v22 = vsel %vm895_vm12, %v897_v14, %v893_v16  ;;  %vm839_vm15 = vmor %vm837_vm14, %vm838_vm13  ;;  %v1413_v23 = vpop.eup %1412 }
 0xa8f   :  { %v900_v24 = vsel %vm1824_vm3, %v1411_v20, %v898_v22  ;;  %v834_v26 = vsub.f32 1.0, %v833_v18 }
 0xa90   :  { %901 = vrot.lane.b32.xlu0 %v900_v24, %s1670_s29  ;;  %v906_v21 = vmul.f32 %v900_v24, %v2367_v35 }
 0xa91   :  { %v835_v30 = vmul.f32 %v1409_v37, %v834_v26 }
 0xa93   :  { %v836_v40 = vadd.f32 %v1409_v37, %v835_v30 }
 0xa95   :  { %v840_v42 = vsel %vm839_vm15, %v1409_v37, %v836_v40 }
 0xa96   :  { %v845_v2 = vsel %vm842_vm0, %v844_v19, %v840_v42 }
 0xa97   :  { %v847_v46 = vsel %vm1824_vm3, %v1413_v23, %v845_v2 }
 0xa98   :  { %848 = vrot.lane.b32.xlu1 %v847_v46, %s1670_s29  ;;  %v853_v45 = vmul.f32 %v847_v46, %v2372_v48 }
 0xb02   :  { %v902_v43 = vpop.permute.xlu0 %901 }
 0xb03   :  { %v903_v7 = vmul.f32 %v902_v43, %v900_v24 }
 0xb05   :  { %904 = vrot.lane.b32.xlu2 %v903_v7, %s1671_s30 }
 0xb0a   :  { %v849_v32 = vpop.permute.xlu1 %848 }
 0xb0b   :  { %v850_v9 = vmul.f32 %v849_v32, %v847_v46 }
 0xb0d   :  { %851 = vrot.lane.b32.xlu0 %v850_v9, %s1671_s30 }
 0xb5f   :  { %v905_v5 = vpop.permute.xlu2 %904 }
 0xb60   :  { %v2433_v55 = vadd.f32 %v906_v21, %v905_v5 }
 0xb62   :  { %1414 = vtanh.f32 %v2433_v55 }
 0xb68   :  { %v1415_v58 = vpop.eup %1414 }
 0xb69   :  { %909 = vrot.lane.b32.xlu1 %v1415_v58, %s1670_s29 }
 0xb7f   :  { %v852_v47 = vpop.permute.xlu0 %851 }
 0xb80   :  { %v2438_v3 = vadd.f32 %v853_v45, %v852_v47  ;;  %v2539_v47 = vld [vmem:[#allocation16_spill] sm:$0xff] }
 0xb82   :  { %1416 = vtanh.f32 %v2438_v3 }
 0xb88   :  { %v1417_v39 = vpop.eup %1416 }
 0xb89   :  { %856 = vrot.lane.b32.xlu2 %v1417_v39, %s1670_s29  ;;  %v180_v39 = vadd.f32 %v2537_v59, %v2539_v47 }
 0xbdb   :  { %v910_v34 = vpop.permute.xlu1 %909 }
 0xbdc   :  { %v911_v35 = vmul.f32 %v910_v34, %v900_v24 }
 0xbde   :  { %928 = vmatmul.f32.vlgmr.msra.gmra.mxu2 %v911_v35  ;;  %1000 = vmatmul.f32.vlgmr.msra.gmra.mxu0 %v911_v35 }
 0xbe3   :  { %v857_v15 = vpop.permute.xlu2 %856 }
 0xbe4   :  { %v858_v56 = vmul.f32 %v857_v15, %v847_v46 }
 0xbe6   :  { %948 = vmatmul.f32.vlgmr.msra.gmra.mxu3 %v858_v56 }
 0xc5b   :  { %v1001_v31 = vpop.f32.mrf.mxu0 }
 0xc5c   :  { %v1004_v48 = vadd.f32 %v1001_v31, %v177_v44 }
 0xc5e   :  { %v1312_v61 = vmul.f32 -1.442695, %v1004_v48 }
 0xc60   :  { %1418 = vpow2.f32 %v1312_v61 }
 0xc61   :  { %v929_v62 = vpop.f32.mrf.mxu2 }
 0xc62   :  { %v930_v60 = vadd.f32 %v2421_v10, %v929_v62 }
 0xc66   :  { %v1419_v0 = vpop.eup %1418 }
 0xc67   :  { %v1009_v4 = vadd.f32 1.0, %v1419_v0 }
 0xc69   :  { %1420 = vrcp.f32 %v1009_v4  ;;  %v949_v63 = vpop.f32.mrf.mxu3  ;;  %v1021_v52 = vand.u32 2147483648, %v1009_v4  ;;  %v1019_v41 = vand.u32 2147483647, %v1009_v4  ;;  %vm1015_vm2 = vweird.f32 %v1009_v4 }
 0xc6a   :  { %v950_v1 = vadd.f32 %v949_v63, %v930_v60 }
 0xc6b   :  { %v1022_v25 = vor.u32 1.1754944e-38, %v1021_v52  ;;  %vm1020_vm5 = vcmp.eq.f32.partialorder %v1019_v41, 8.507059e+37 }
 0xc6c   :  { %v1311_v6 = vmul.f32 -1.442695, %v950_v1 }
 0xc6e   :  { %1422 = vpow2.f32 %v1311_v6 }
 0xc6f   :  { %v1421_v8 = vpop.eup %1420  ;;  %1424 = vtanh.f32 %v1004_v48 }
 0xc70   :  { %v1011_v12 = vmul.f32 %v1421_v8, %v1009_v4  ;;  %vm1016_vm1 = vweird.f32 %v1421_v8 }
 0xc71   :  { %vm1017_vm4 = vmor %vm1015_vm2, %vm1016_vm1 }
 0xc72   :  { %v1012_v13 = vsub.f32 1.0, %v1011_v12 }
 0xc74   :  { %v1423_v54 = vpop.eup %1422  ;;  %v1013_v38 = vmul.f32 %v1421_v8, %v1012_v13 }
 0xc75   :  { %v956_v17 = vadd.f32 1.0, %v1423_v54  ;;  %v1425_v57 = vpop.eup %1424 }
 0xc76   :  { %v1014_v11 = vadd.f32 %v1421_v8, %v1013_v38 }
 0xc77   :  { %1426 = vrcp.f32 %v956_v17  ;;  %v968_v14 = vand.u32 2147483648, %v956_v17  ;;  %v966_v18 = vand.u32 2147483647, %v956_v17  ;;  %vm962_vm7 = vweird.f32 %v956_v17 }
 0xc78   :  { %v1018_v27 = vsel %vm1017_vm4, %v1421_v8, %v1014_v11  ;;  %1428 = vtanh.f32 %v950_v1 }
 0xc79   :  { %v1023_v33 = vsel %vm1020_vm5, %v1022_v25, %v1018_v27  ;;  %v969_v22 = vor.u32 1.1754944e-38, %v968_v14  ;;  %vm967_vm9 = vcmp.eq.f32.partialorder %v966_v18, 8.507059e+37 }
 0xc7a   :  { %v1025_v53 = vsel %vm1824_vm3, %v1425_v57, %v1023_v33 }
 0xc7b   :  { %1026 = vrot.lane.b32.xlu0 %v1025_v53, %s1670_s29  ;;  %v1031_v23 = vmul.f32 %v1025_v53, %v2433_v55 }
 0xc7d   :  { %v1427_v51 = vpop.eup %1426 }
 0xc7e   :  { %v958_v29 = vmul.f32 %v1427_v51, %v956_v17  ;;  %vm963_vm6 = vweird.f32 %v1427_v51  ;;  %v1429_v26 = vpop.eup %1428 }
 0xc7f   :  { %vm964_vm8 = vmor %vm962_vm7, %vm963_vm6 }
 0xc80   :  { %v959_v37 = vsub.f32 1.0, %v958_v29 }
 0xc82   :  { %v960_v16 = vmul.f32 %v1427_v51, %v959_v37 }
 0xc84   :  { %v961_v20 = vadd.f32 %v1427_v51, %v960_v16 }
 0xc86   :  { %v965_v24 = vsel %vm964_vm8, %v1427_v51, %v961_v20 }
 0xc87   :  { %v970_v28 = vsel %vm967_vm9, %v969_v22, %v965_v24 }
 0xc88   :  { %v972_v30 = vsel %vm1824_vm3, %v1429_v26, %v970_v28 }
 0xc89   :  { %973 = vrot.lane.b32.xlu1 %v972_v30, %s1670_s29  ;;  %v978_v7 = vmul.f32 %v972_v30, %v2438_v3 }
 0xced   :  { %v1027_v36 = vpop.permute.xlu0 %1026 }
 0xcee   :  { %v1028_v40 = vmul.f32 %v1027_v36, %v1025_v53 }
 0xcf0   :  { %1029 = vrot.lane.b32.xlu2 %v1028_v40, %s1671_s30 }
 0xcfb   :  { %v974_v19 = vpop.permute.xlu1 %973 }
 0xcfc   :  { %v975_v42 = vmul.f32 %v974_v19, %v972_v30 }
 0xcfe   :  { %976 = vrot.lane.b32.xlu0 %v975_v42, %s1671_s30 }
 0xd4a   :  { %v1030_v2 = vpop.permute.xlu2 %1029 }
 0xd4b   :  { %v2454_v46 = vadd.f32 %v1031_v23, %v1030_v2 }
 0xd4d   :  { %1430 = vtanh.f32 %v2454_v46 }
 0xd53   :  { %v1431_v43 = vpop.eup %1430 }
 0xd54   :  { %1034 = vrot.lane.b32.xlu1 %v1431_v43, %s1670_s29 }
 0xd70   :  { %v977_v32 = vpop.permute.xlu0 %976 }
 0xd71   :  { %v2459_v9 = vadd.f32 %v978_v7, %v977_v32 }
 0xd73   :  { %1432 = vtanh.f32 %v2459_v9 }
 0xd79   :  { %v1433_v21 = vpop.eup %1432 }
 0xd7a   :  { %981 = vrot.lane.b32.xlu2 %v1433_v21, %s1670_s29 }
 0xdc6   :  { %v1035_v5 = vpop.permute.xlu1 %1034 }
 0xdc7   :  { %v1036_v55 = vmul.f32 %v1035_v5, %v1025_v53 }
 0xdc9   :  { %1053 = vmatmul.f32.vlgmr.msrb.gmra.mxu1 %v1036_v55  ;;  %1125 = vmatmul.f32.vlgmr.msrb.gmra.mxu3 %v1036_v55 }
 0xdd4   :  { %v982_v58 = vpop.permute.xlu2 %981 }
 0xdd5   :  { %v983_v45 = vmul.f32 %v982_v58, %v972_v30 }
 0xdd7   :  { %1073 = vmatmul.f32.vlgmr.msrb.gmra.mxu2 %v983_v45 }
 0xe46   :  { %v1054_v15 = vpop.f32.mrf.mxu1 }
 0xe47   :  { %v1055_v44 = vadd.f32 %v2421_v10, %v1054_v15 }
 0xe4c   :  { %v1126_v34 = vpop.f32.mrf.mxu3 }
 0xe4d   :  { %v1129_v3 = vadd.f32 %v1126_v34, %v180_v39 }
 0xe4f   :  { %v1314_v35 = vmul.f32 -1.442695, %v1129_v3 }
 0xe51   :  { %1434 = vpow2.f32 %v1314_v35 }
 0xe57   :  { %v1435_v56 = vpop.eup %1434 }
 0xe58   :  { %v1134_v49 = vadd.f32 1.0, %v1435_v56 }
 0xe5a   :  { %1436 = vrcp.f32 %v1134_v49  ;;  %v1074_v31 = vpop.f32.mrf.mxu2  ;;  %v1146_v60 = vand.u32 2147483648, %v1134_v49  ;;  %v1144_v1 = vand.u32 2147483647, %v1134_v49  ;;  %vm1140_vm11 = vweird.f32 %v1134_v49 }
 0xe5b   :  { %v1075_v48 = vadd.f32 %v1074_v31, %v1055_v44 }
 0xe5c   :  { %v1147_v12 = vor.u32 1.1754944e-38, %v1146_v60  ;;  %vm1145_vm13 = vcmp.eq.f32.partialorder %v1144_v1, 8.507059e+37  ;;  %v1246_v60 = vld [vmem:[#allocation10 + $0x60] sm:$0xff]  ;;  %v1243_v1 = vld [vmem:[#allocation10 + $0x48] sm:$0xff] }
 0xe5d   :  { %v1313_v61 = vmul.f32 -1.442695, %v1075_v48 }
 0xe5f   :  { %1438 = vpow2.f32 %v1313_v61 }
 0xe60   :  { %v1437_v62 = vpop.eup %1436  ;;  %1440 = vtanh.f32 %v1129_v3 }
 0xe61   :  { %v1136_v0 = vmul.f32 %v1437_v62, %v1134_v49  ;;  %vm1141_vm10 = vweird.f32 %v1437_v62 }
 0xe62   :  { %vm1142_vm12 = vmor %vm1140_vm11, %vm1141_vm10 }
 0xe63   :  { %v1137_v4 = vsub.f32 1.0, %v1136_v0  ;;  %v1248_v0 = vld [vmem:[#allocation10 + $0x70] sm:$0xff] }
 0xe65   :  { %v1439_v59 = vpop.eup %1438  ;;  %v1138_v63 = vmul.f32 %v1437_v62, %v1137_v4  ;;  %v1247_v4 = vld [vmem:[#allocation10 + $0x68] sm:$0xff] }
 0xe66   :  { %v1081_v6 = vadd.f32 1.0, %v1439_v59  ;;  %v1441_v52 = vpop.eup %1440  ;;  %v1245_v59 = vld [vmem:[#allocation10 + $0x58] sm:$0xff] }
 0xe67   :  { %v1139_v8 = vadd.f32 %v1437_v62, %v1138_v63  ;;  %v1244_v63 = vld [vmem:[#allocation10 + $0x50] sm:$0xff] }
 0xe68   :  { %1442 = vrcp.f32 %v1081_v6  ;;  %v1093_v25 = vand.u32 2147483648, %v1081_v6  ;;  %v1091_v57 = vand.u32 2147483647, %v1081_v6  ;;  %vm1087_vm15 = vweird.f32 %v1081_v6 }
 0xe69   :  { %v1143_v13 = vsel %vm1142_vm12, %v1437_v62, %v1139_v8  ;;  %1444 = vtanh.f32 %v1075_v48  ;;  %v1249_v62 = vld [vmem:[#allocation10 + $0x78] sm:$0xff]  ;;  %v1240_v8 = vld [vmem:[#allocation10 + $0x30] sm:$0xff] }
 0xe6a   :  { %v1148_v54 = vsel %vm1145_vm13, %v1147_v12, %v1143_v13  ;;  %v1094_v53 = vor.u32 1.1754944e-38, %v1093_v25  ;;  %vm1092_vm1 = vcmp.eq.f32.partialorder %v1091_v57, 8.507059e+37  ;;  %1254 = vmatpush.msra.mxu2 %v1249_v62  ;;  %v1239_v12 = vld [vmem:[#allocation10 + $0x28] sm:$0xff]  ;;  %v1238_v13 = vld [vmem:[#allocation10 + $0x20] sm:$0xff] }
 0xe6b   :  { %v1150_v38 = vsel %vm1824_vm3, %v1441_v52, %v1148_v54 }
 0xe6c   :  { %1151 = vrot.lane.b32.xlu0 %v1150_v38, %s1670_s29  ;;  %v1156_v24 = vmul.f32 %v1150_v38, %v2454_v46  ;;  %1255 = vmatpush.msra.mxu2 %v1248_v0 }
 0xe6e   :  { %v1443_v41 = vpop.eup %1442  ;;  %1256 = vmatpush.msra.mxu2 %v1247_v4 }
 0xe6f   :  { %v1083_v17 = vmul.f32 %v1443_v41, %v1081_v6  ;;  %vm1088_vm14 = vweird.f32 %v1443_v41  ;;  %v1445_v29 = vpop.eup %1444  ;;  %v1241_v6 = vld [vmem:[#allocation10 + $0x38] sm:$0xff] }
 0xe70   :  { %vm1089_vm0 = vmor %vm1087_vm15, %vm1088_vm14  ;;  %1257 = vmatpush.msra.mxu2 %v1246_v60 }
 0xe71   :  { %v1084_v11 = vsub.f32 1.0, %v1083_v17  ;;  %v1236_v17 = vld [vmem:[#allocation10 + $0x10] sm:$0xff] }
 0xe72   :  { %1258 = vmatpush.msra.mxu2 %v1245_v59 }
 0xe73   :  { %v1085_v27 = vmul.f32 %v1443_v41, %v1084_v11  ;;  %v1235_v11 = vld [vmem:[#allocation10 + $0x8] sm:$0xff] }
 0xe74   :  { %1259 = vmatpush.msra.mxu2 %v1244_v63 }
 0xe75   :  { %v1086_v33 = vadd.f32 %v1443_v41, %v1085_v27  ;;  %v1234_v27 = vld [vmem:[#allocation10] sm:$0xff] }
 0xe76   :  { %1260 = vmatpush.msra.mxu2 %v1243_v1 }
 0xe77   :  { %v1090_v51 = vsel %vm1089_vm0, %v1443_v41, %v1086_v33 }
 0xe78   :  { %v1095_v37 = vsel %vm1092_vm1, %v1094_v53, %v1090_v51  ;;  %1261 = vmatpush.msra.mxu2 %v1242_v50  ;;  %v1329_v53 = vld [vmem:[%s2499_s7] ss:$0 sm:$0xff] }
 0xe79   :  { %v1097_v14 = vsel %vm1824_vm3, %v1445_v29, %v1095_v37 }
 0xe7a   :  { %1098 = vrot.lane.b32.xlu1 %v1097_v14, %s1670_s29  ;;  %v1103_v36 = vmul.f32 %v1097_v14, %v2459_v9  ;;  %1262 = vmatpush.msra.mxu2 %v1241_v6 }
 0xe7c   :  { %1263 = vmatpush.msra.mxu2 %v1240_v8 }
 0xe7e   :  { %1264 = vmatpush.msra.mxu2 %v1239_v12 }
 0xe80   :  { %1265 = vmatpush.msra.mxu2 %v1238_v13 }
 0xede   :  { %v1152_v16 = vpop.permute.xlu0 %1151 }
 0xedf   :  { %v1153_v18 = vmul.f32 %v1152_v16, %v1150_v38 }
 0xee1   :  { %1154 = vrot.lane.b32.xlu2 %v1153_v18, %s1671_s30 }
 0xeec   :  { %v1099_v20 = vpop.permute.xlu1 %1098 }
 0xeed   :  { %v1100_v22 = vmul.f32 %v1099_v20, %v1097_v14 }
 0xeef   :  { %1101 = vrot.lane.b32.xlu0 %v1100_v22, %s1671_s30 }
 0xf3b   :  { %v1155_v26 = vpop.permute.xlu2 %1154 }
 0xf3c   :  { %v1157_v28 = vadd.f32 %v1156_v24, %v1155_v26 }
 0xf3e   :  { %1446 = vtanh.f32 %v1157_v28 }
 0xf44   :  { %v1447_v30 = vpop.eup %1446 }
 0xf45   :  { %1159 = vrot.lane.b32.xlu1 %v1447_v30, %s1670_s29 }
 0xf61   :  { %v1102_v40 = vpop.permute.xlu0 %1101 }
 0xf62   :  { %v1104_v19 = vadd.f32 %v1103_v36, %v1102_v40 }
 0xf64   :  { %1448 = vtanh.f32 %v1104_v19 }
 0xf6a   :  { %v1449_v42 = vpop.eup %1448 }
 0xf6b   :  { %1106 = vrot.lane.b32.xlu2 %v1449_v42, %s1670_s29 }
 0xfb7   :  { %v1160_v23 = vpop.permute.xlu1 %1159 }
 0xfb8   :  { %v1161_v2 = vmul.f32 %v1160_v23, %v1150_v38  ;;  %v1237_v38 = vld [vmem:[#allocation10 + $0x18] sm:$0xff] }
 0xfb9   :  { %1266 = vmatpush.msra.mxu2 %v1237_v38 }
 0xfba   :  { %1178 = vmatmul.f32.vlgmr.msrb.gmra.mxu0 %v1161_v2 }
 0xfbb   :  { %1267 = vmatpush.msra.mxu2 %v1236_v17 }
 0xfbd   :  { %1268 = vmatpush.msra.mxu2 %v1235_v11 }
 0xfbf   :  { %1269 = vmatpush.msra.mxu2 %v1234_v27 }
 0xfc5   :  { %v1107_v43 = vpop.permute.xlu2 %1106 }
 0xfc6   :  { %v1108_v7 = vmul.f32 %v1107_v43, %v1097_v14  ;;  %v2540_v14 = vld [vmem:[#allocation19_spill] sm:$0xff] }
 0xfc7   :  { %vm1275_vm7 = vcmp.lt.s32.totalorder %v2540_v14, 8 }
 0xfc8   :  { %1198 = vmatmul.f32.vlgmr.msra.gmra.mxu1 %v1108_v7 }
0x1037   :  { %v1179_v46 = vpop.f32.mrf.mxu0 }
0x1038   :  { %v1180_v32 = vadd.f32 %v2421_v10, %v1179_v46 }
0x1045   :  { %v1199_v21 = vpop.f32.mrf.mxu1 }
0x1046   :  { %v1200_v5 = vadd.f32 %v1199_v21, %v1180_v32 }
0x1048   :  { %v1315_v55 = vmul.f32 -1.442695, %v1200_v5 }
0x104a   :  { %1450 = vpow2.f32 %v1315_v55 }
0x1050   :  { %v1451_v9 = vpop.eup %1450 }
0x1051   :  { %v1206_v58 = vadd.f32 1.0, %v1451_v9 }
0x1053   :  { %1452 = vrcp.f32 %v1206_v58  ;;  %v1218_v34 = vand.u32 2147483648, %v1206_v58  ;;  %v1216_v35 = vand.u32 2147483647, %v1206_v58  ;;  %vm1212_vm4 = vweird.f32 %v1206_v58 }
0x1054   :  { %1454 = vtanh.f32 %v1200_v5 }
0x1055   :  { %v1219_v56 = vor.u32 1.1754944e-38, %v1218_v34  ;;  %vm1217_vm6 = vcmp.eq.f32.partialorder %v1216_v35, 8.507059e+37 }
0x1059   :  { %v1453_v45 = vpop.eup %1452 }
0x105a   :  { %v1208_v47 = vmul.f32 %v1453_v45, %v1206_v58  ;;  %vm1213_vm2 = vweird.f32 %v1453_v45  ;;  %v1455_v49 = vpop.eup %1454 }
0x105b   :  { %vm1214_vm5 = vmor %vm1212_vm4, %vm1213_vm2 }
0x105c   :  { %v1209_v39 = vsub.f32 1.0, %v1208_v47 }
0x105e   :  { %v1210_v3 = vmul.f32 %v1453_v45, %v1209_v39 }
0x1060   :  { %v1211_v15 = vadd.f32 %v1453_v45, %v1210_v3 }
0x1062   :  { %v1215_v10 = vsel %vm1214_vm5, %v1453_v45, %v1211_v15 }
0x1063   :  { %v1220_v44 = vsel %vm1217_vm6, %v1219_v56, %v1215_v10 }
0x1064   :  { %v1222_v31 = vsel %vm1824_vm3, %v1455_v49, %v1220_v44  ;;  %vm1274_vm3 = vcmp.ge.s32.totalorder %v2540_v14, 4 }
0x1065   :  { %1223 = vrot.lane.b32.xlu0 %v1222_v31, %s1670_s29  ;;  %v1228_v52 = vmul.f32 %v1222_v31, %v1104_v19  ;;  %vm1276_vm8 = vmand %vm1274_vm3, %vm1275_vm7 }
0x10d7   :  { %v1224_v48 = vpop.permute.xlu0 %1223 }
0x10d8   :  { %v1225_v61 = vmul.f32 %v1224_v48, %v1222_v31 }
0x10da   :  { %1226 = vrot.lane.b32.xlu1 %v1225_v61, %s1671_s30 }
0x114c   :  { %v1227_v54 = vpop.permute.xlu1 %1226 }
0x114d   :  { %v1229_v41 = vadd.f32 %v1228_v52, %v1227_v54 }
0x114f   :  { %1456 = vtanh.f32 %v1229_v41 }
0x1155   :  { %v1457_v25 = vpop.eup %1456 }
0x1156   :  { %1231 = vrot.lane.b32.xlu2 %v1457_v25, %s1670_s29 }
0x11b0   :  { %v1232_v57 = vpop.permute.xlu2 %1231 }
0x11b1   :  { %v1233_v33 = vmul.f32 %v1232_v57, %v1222_v31 }
0x11b3   :  { %1270 = vmatmul.f32.vlgmr.msra.gmra.mxu2 %v1233_v33 }
0x1236   :  { %v1271_v51 = vpop.f32.mrf.mxu2 }
0x1237   :  { %v1272_v29 = vadd.f32 %v1329_v53, %v1271_v51 }
0x1239   :  { %v1277_v37 = vmul.f32 1.442695, %v1272_v29 }
0x123b   :  { %1458 = vpow2.f32 %v1277_v37 }
0x1241   :  { %v1459_v16 = vpop.eup %1458 }
0x1242   :  { %v1279_v18 = vsel %vm1276_vm8, %v1459_v16, %v1272_v29 }
0x1243   :  { %1280 = vst [vmem:[#allocation11] sm:$0xff] %v1279_v18 }
0x1244   :  { %1291 = dma.vmem_to_hbm [thread:$0]  %s1287_s16, 128, %s1289_s19, [#allocation4]  }
0x1245   :  { %1660 = dma.done.wait [#allocation4], 128  }
0x1246   :  { %1661 = vsyncadd [#allocation4], 4294967168 }
0x1247   :  { %1296 = vsyncpa [#allocation3], 1 }
0x1248   :  { %1297 = vsyncpa [#allocation6], 1 }
0x1249   :  { %1298 = vsyncpa [#allocation9], 1 }
0x124a   :  { %1299 = vsyncpa [#allocation4], 1 }

</bundles_post_ra>
